<compile_context>
chip_gen: v6e
topology: v6e:2x2x1
jax: 0.10.0
libtpu: 0.0.40
codegen_flags: <defaults>
</compile_context>

<pallas_src>
import functools

import jax
import jax.numpy as jnp
from jax.experimental import pallas as pl
from jax.experimental.pallas import tpu as pltpu

KMAX = 9                 # largest depthwise kernel size
PAD = (KMAX - 1) // 2    # "same" padding for the folded 9x9 kernel
N_ACC = 4                # independent accumulators (VALU has 4 issue slots)


def _mixer_kernel(x_ref, w_ref, b_ref, o_ref, col_scr, *, HB, W, CC):
    # x_ref:   (1, Hp, Wp*CC)  zero-padded, lane-packed input tile (CC = 2*C)
    # w_ref:   (81, HB, W*CC)  folded 9x9 tap weights, pre-tiled across lanes
    #                          and pre-broadcast across the HB output sublanes
    # b_ref:   (HB, W*CC)      combined bias, pre-broadcast/tiled (f32)
    # o_ref:   (1, HB, W*CC)   output row-block
    # col_scr: (9, HB+2*PAD, W*CC) VMEM scratch holding the 9 lane-shifted
    #          column slabs (one lane realignment per column offset, not 81)
    WCC = W * CC
    HCOL = HB + 2 * PAD

    hoff = pl.program_id(1) * HB          # first output row of this block
    if HB % 8 == 0:
        hoff = pl.multiple_of(hoff, 8)    # sublane-aligned row offset

    # Accumulator 0 starts from the (pre-broadcast) bias: bias add is free.
    accs = [b_ref[...].astype(jnp.float32)] + [
        jnp.zeros((HB, WCC), jnp.float32) for _ in range(N_ACC - 1)
    ]

    for e in range(KMAX):
        # One lane-shifted extraction per column offset e (9 total).
        col_scr[e] = x_ref[0, pl.ds(hoff, HCOL), pl.ds(e * CC, WCC)]
        for d in range(KMAX):
            t = d * KMAX + e
            # Plain row-offset VMEM loads: no lane realignment, no broadcast.
            tap = col_scr[e, d:d + HB, :].astype(jnp.float32)
            w_t = w_ref[t].astype(jnp.float32)
            accs[t % N_ACC] = accs[t % N_ACC] + tap * w_t

    acc = (accs[0] + accs[1]) + (accs[2] + accs[3])
    o_ref[0] = jnp.maximum(acc, 0.0).astype(o_ref.dtype)


def feature_mixer_pallas(x_nchw, w5, b5, w7, b7, w9, b9, *,
                         h_blocks=None, storage_dtype=jnp.float32):
    """x_nchw: [N, C, H, W]; wK: PyTorch depthwise weights [C, 1, K, K]; bK: [C]."""
    N, C, H, W = x_nchw.shape

    # Pad the batch to an even count so two images pack onto one 128-lane row.
    Npad = N + (N % 2)
    if Npad != N:
        x_nchw = jnp.pad(x_nchw, ((0, 1), (0, 0), (0, 0), (0, 0)))
    NP = Npad // 2
    CC = 2 * C                      # packed channel stride (two images interleaved)
    WCC = W * CC
    Hp, Wp = H + 2 * PAD, W + 2 * PAD

    if h_blocks is None:
        # Split output rows across the two v7x TensorCores only when there are
        # too few batch-pair blocks AND the per-block compute outweighs the
        # ~600-cycle per-step overhead.  At small H a single step wins on all
        # generations (single-TC v5e/v6e are pure-overhead bound otherwise).
        h_blocks = 2 if (NP < 2 and H >= 64 and (H // 2) % 8 == 0) else 1
    assert H % h_blocks == 0
    HB = H // h_blocks
    assert h_blocks == 1 or HB % 8 == 0

    # --- relayout: NCHW -> lane-packed, zero-padded NHWC ---------------------
    # lane index = w*(2C) + img_in_pair*C + c
    x = jnp.transpose(x_nchw.astype(storage_dtype), (0, 2, 3, 1))   # (Npad,H,W,C)
    x = x.reshape(NP, 2, H, W, C)
    x = jnp.transpose(x, (0, 2, 3, 1, 4))                           # (NP,H,W,2,C)
    xp = jnp.pad(x, ((0, 0), (PAD, PAD), (PAD, PAD), (0, 0), (0, 0)))
    xp = xp.reshape(NP, Hp, Wp * CC)
    # TODO(synk): at large H*W do the zero padding in-kernel (VMEM scratch) to
    # avoid the extra padded copy in HBM; negligible at this problem size.

    # --- fold the 5/7/9 depthwise kernels into one 9x9 kernel (exact) --------
    def to_hwc(wk):  # [C, 1, K, K] -> [K, K, C]
        return jnp.transpose(wk[:, 0, :, :], (1, 2, 0)).astype(jnp.float32)

    w_all = jnp.zeros((KMAX, KMAX, C), jnp.float32)
    for wk in (w5, w7, w9):
        K = wk.shape[-1]
        off = (KMAX - K) // 2
        w_all = w_all.at[off:off + K, off:off + K, :].add(to_hwc(wk))

    # Tile each tap's C-vector across (W positions x 2 packed images) = 128
    # lanes, then pre-broadcast across the HB output sublanes so the kernel
    # needs no per-tap sublane-broadcast op (plain vector loads instead).
    w_row = jnp.tile(w_all.reshape(KMAX * KMAX, C), (1, 2 * W))          # (81, WCC)
    w_tab = jnp.tile(w_row[:, None, :], (1, HB, 1)).astype(storage_dtype)  # (81,HB,WCC)
    bias = jnp.tile((b5 + b7 + b9).astype(jnp.float32).reshape(1, C),
                    (HB, 2 * W))                                          # (HB, WCC)

    kernel = functools.partial(_mixer_kernel, HB=HB, W=W, CC=CC)
    out = pl.pallas_call(
        kernel,
        out_shape=jax.ShapeDtypeStruct((NP, H, WCC), jnp.float32),
        grid=(NP, h_blocks),
        in_specs=[
            pl.BlockSpec((1, Hp, Wp * CC), lambda n, h: (n, 0, 0)),
            pl.BlockSpec((KMAX * KMAX, HB, WCC), lambda n, h: (0, 0, 0)),
            pl.BlockSpec((HB, WCC), lambda n, h: (0, 0)),
        ],
        out_specs=pl.BlockSpec((1, HB, WCC), lambda n, h: (n, h, 0)),
        scratch_shapes=[pltpu.VMEM((KMAX, HB + 2 * PAD, WCC), storage_dtype)],
        compiler_params=pltpu.CompilerParams(
            dimension_semantics=("parallel", "parallel")),
    )(xp, w_tab, bias)

    # --- unpack: lane-packed NHWC -> PyTorch NCHW -----------------------------
    y = out.reshape(NP, H, W, 2, C)
    y = jnp.transpose(y, (0, 3, 4, 1, 2)).reshape(Npad, C, H, W)
    return y[:N]


def _reference(x_nchw, params):
    # Pure-JAX reference of the PyTorch forward (three depthwise convs + ReLU).
    C = x_nchw.shape[1]
    out = jnp.zeros_like(x_nchw)
    for (w, b) in params:
        K = w.shape[-1]
        pad = (K - 1) // 2
        y = jax.lax.conv_general_dilated(
            x_nchw, w, window_strides=(1, 1),
            padding=[(pad, pad), (pad, pad)],
            dimension_numbers=("NCHW", "OIHW", "NCHW"),
            feature_group_count=C)
        out = out + y + b[None, :, None, None]
    return jnp.maximum(out, 0.0)


if __name__ == "__main__":
    N, C, H, W = 2, 4, 16, 16  # io_size = C = 4

    key = jax.random.PRNGKey(0)
    k = jax.random.split(key, 7)
    # Deterministic synthetic parameters (PyTorch depthwise shapes [C,1,K,K], bias [C]).
    w5 = jax.random.normal(k[0], (C, 1, 5, 5), jnp.float32) * 0.1
    b5 = jax.random.normal(k[1], (C,), jnp.float32) * 0.1
    w7 = jax.random.normal(k[2], (C, 1, 7, 7), jnp.float32) * 0.1
    b7 = jax.random.normal(k[3], (C,), jnp.float32) * 0.1
    w9 = jax.random.normal(k[4], (C, 1, 9, 9), jnp.float32) * 0.1
    b9 = jax.random.normal(k[5], (C,), jnp.float32) * 0.1
    x = jax.random.normal(k[6], (N, C, H, W), jnp.float32)

    out = feature_mixer_pallas(x, w5, b5, w7, b7, w9, b9)
    out = jax.block_until_ready(out)

    ref = _reference(x, [(w5, b5), (w7, b7), (w9, b9)])
    assert out.shape == (N, C, H, W)
    assert jnp.allclose(out, ref, atol=1e-4, rtol=1e-4), "mismatch vs reference"

    print("KERNEL_OK")
</pallas_src>

<mosaic_0001>
module attributes {stable_mosaic.version = 11 : i64} {
  func.func @_mixer_kernel(%arg0: i32, %arg1: i32, %arg2: memref<1x24x192xf32, #tpu.memory_space<vmem>>, %arg3: memref<81x16x128xf32, #tpu.memory_space<vmem>>, %arg4: memref<16x128xf32, #tpu.memory_space<vmem>>, %arg5: memref<1x16x128xf32, #tpu.memory_space<vmem>>, %arg6: memref<9x24x128xf32, #tpu.memory_space<vmem>>) attributes {dimension_semantics = [#tpu.dimension_semantics<parallel>, #tpu.dimension_semantics<parallel>], iteration_bounds = array<i64: 1, 1>, scalar_prefetch = 0 : i64, scratch_operands = 1 : i64, tpu.core_type = #tpu.core_type<tc>, window_params = [{transform_indices = @transform_0, window_bounds = array<i64: 1, 24, 192>}, {pipeline_mode = #tpu.pipeline_mode<synchronous>, transform_indices = @transform_1, window_bounds = array<i64: 81, 16, 128>}, {pipeline_mode = #tpu.pipeline_mode<synchronous>, transform_indices = @transform_2, window_bounds = array<i64: 16, 128>}, {transform_indices = @transform_3, window_bounds = array<i64: 1, 16, 128>}]} {
    %c16_i32 = arith.constant 16 : i32
    %0 = arith.muli %arg1, %c16_i32 : i32
    %1 = tpu.assume_multiple %0, 8 : i32
    %c0 = arith.constant 0 : index
    %c0_0 = arith.constant 0 : index
    %2 = vector.load %arg4[%c0, %c0_0] : memref<16x128xf32, #tpu.memory_space<vmem>>, vector<16x128xf32>
    %cst = arith.constant 0.000000e+00 : f32
    %3 = vector.broadcast %cst : f32 to vector<16x128xf32>
    %cst_1 = arith.constant 0.000000e+00 : f32
    %4 = vector.broadcast %cst_1 : f32 to vector<16x128xf32>
    %cst_2 = arith.constant 0.000000e+00 : f32
    %5 = vector.broadcast %cst_2 : f32 to vector<16x128xf32>
    %c0_3 = arith.constant 0 : index
    %6 = arith.index_cast %1 : i32 to index
    %c0_4 = arith.constant 0 : index
    %7 = vector.load %arg2[%c0_3, %6, %c0_4] : memref<1x24x192xf32, #tpu.memory_space<vmem>>, vector<1x24x128xf32>
    %8 = vector.shape_cast %7 : vector<1x24x128xf32> to vector<24x128xf32>
    %c0_5 = arith.constant 0 : index
    %c0_6 = arith.constant 0 : index
    %c0_7 = arith.constant 0 : index
    %9 = vector.load %arg6[%c0_5, %c0_6, %c0_7] : memref<9x24x128xf32, #tpu.memory_space<vmem>>, vector<1x24x128xf32>
    %10 = vector.shape_cast %9 : vector<1x24x128xf32> to vector<24x128xf32>
    %11 = vector.shape_cast %8 : vector<24x128xf32> to vector<1x24x128xf32>
    tpu.vector_store %arg6[%c0_5, %c0_6, %c0_7], %11 {strides = array<i32>} : memref<9x24x128xf32, #tpu.memory_space<vmem>>, vector<1x24x128xf32>,
    %c0_8 = arith.constant 0 : index
    %c0_9 = arith.constant 0 : index
    %c0_10 = arith.constant 0 : index
    %12 = vector.load %arg6[%c0_8, %c0_9, %c0_10] : memref<9x24x128xf32, #tpu.memory_space<vmem>>, vector<1x16x128xf32>
    %13 = vector.shape_cast %12 : vector<1x16x128xf32> to vector<16x128xf32>
    %c0_11 = arith.constant 0 : index
    %c0_12 = arith.constant 0 : index
    %c0_13 = arith.constant 0 : index
    %14 = vector.load %arg3[%c0_11, %c0_12, %c0_13] : memref<81x16x128xf32, #tpu.memory_space<vmem>>, vector<1x16x128xf32>
    %15 = vector.shape_cast %14 : vector<1x16x128xf32> to vector<16x128xf32>
    %16 = arith.mulf %13, %15 : vector<16x128xf32>
    %17 = arith.addf %2, %16 : vector<16x128xf32>
    %c0_14 = arith.constant 0 : index
    %c1 = arith.constant 1 : index
    %c0_15 = arith.constant 0 : index
    %18 = vector.load %arg6[%c0_14, %c1, %c0_15] : memref<9x24x128xf32, #tpu.memory_space<vmem>>, vector<1x16x128xf32>
    %19 = vector.shape_cast %18 : vector<1x16x128xf32> to vector<16x128xf32>
    %c9 = arith.constant 9 : index
    %c0_16 = arith.constant 0 : index
    %c0_17 = arith.constant 0 : index
    %20 = vector.load %arg3[%c9, %c0_16, %c0_17] : memref<81x16x128xf32, #tpu.memory_space<vmem>>, vector<1x16x128xf32>
    %21 = vector.shape_cast %20 : vector<1x16x128xf32> to vector<16x128xf32>
    %22 = arith.mulf %19, %21 : vector<16x128xf32>
    %23 = arith.addf %3, %22 : vector<16x128xf32>
    %c0_18 = arith.constant 0 : index
    %c2 = arith.constant 2 : index
    %c0_19 = arith.constant 0 : index
    %24 = vector.load %arg6[%c0_18, %c2, %c0_19] : memref<9x24x128xf32, #tpu.memory_space<vmem>>, vector<1x16x128xf32>
    %25 = vector.shape_cast %24 : vector<1x16x128xf32> to vector<16x128xf32>
    %c18 = arith.constant 18 : index
    %c0_20 = arith.constant 0 : index
    %c0_21 = arith.constant 0 : index
    %26 = vector.load %arg3[%c18, %c0_20, %c0_21] : memref<81x16x128xf32, #tpu.memory_space<vmem>>, vector<1x16x128xf32>
    %27 = vector.shape_cast %26 : vector<1x16x128xf32> to vector<16x128xf32>
    %28 = arith.mulf %25, %27 : vector<16x128xf32>
    %29 = arith.addf %4, %28 : vector<16x128xf32>
    %c0_22 = arith.constant 0 : index
    %c3 = arith.constant 3 : index
    %c0_23 = arith.constant 0 : index
    %30 = vector.load %arg6[%c0_22, %c3, %c0_23] : memref<9x24x128xf32, #tpu.memory_space<vmem>>, vector<1x16x128xf32>
    %31 = vector.shape_cast %30 : vector<1x16x128xf32> to vector<16x128xf32>
    %c27 = arith.constant 27 : index
    %c0_24 = arith.constant 0 : index
    %c0_25 = arith.constant 0 : index
    %32 = vector.load %arg3[%c27, %c0_24, %c0_25] : memref<81x16x128xf32, #tpu.memory_space<vmem>>, vector<1x16x128xf32>
    %33 = vector.shape_cast %32 : vector<1x16x128xf32> to vector<16x128xf32>
    %34 = arith.mulf %31, %33 : vector<16x128xf32>
    %35 = arith.addf %5, %34 : vector<16x128xf32>
    %c0_26 = arith.constant 0 : index
    %c4 = arith.constant 4 : index
    %c0_27 = arith.constant 0 : index
    %36 = vector.load %arg6[%c0_26, %c4, %c0_27] : memref<9x24x128xf32, #tpu.memory_space<vmem>>, vector<1x16x128xf32>
    %37 = vector.shape_cast %36 : vector<1x16x128xf32> to vector<16x128xf32>
    %c36 = arith.constant 36 : index
    %c0_28 = arith.constant 0 : index
    %c0_29 = arith.constant 0 : index
    %38 = vector.load %arg3[%c36, %c0_28, %c0_29] : memref<81x16x128xf32, #tpu.memory_space<vmem>>, vector<1x16x128xf32>
    %39 = vector.shape_cast %38 : vector<1x16x128xf32> to vector<16x128xf32>
    %40 = arith.mulf %37, %39 : vector<16x128xf32>
    %41 = arith.addf %17, %40 : vector<16x128xf32>
    %c0_30 = arith.constant 0 : index
    %c5 = arith.constant 5 : index
    %c0_31 = arith.constant 0 : index
    %42 = vector.load %arg6[%c0_30, %c5, %c0_31] : memref<9x24x128xf32, #tpu.memory_space<vmem>>, vector<1x16x128xf32>
    %43 = vector.shape_cast %42 : vector<1x16x128xf32> to vector<16x128xf32>
    %c45 = arith.constant 45 : index
    %c0_32 = arith.constant 0 : index
    %c0_33 = arith.constant 0 : index
    %44 = vector.load %arg3[%c45, %c0_32, %c0_33] : memref<81x16x128xf32, #tpu.memory_space<vmem>>, vector<1x16x128xf32>
    %45 = vector.shape_cast %44 : vector<1x16x128xf32> to vector<16x128xf32>
    %46 = arith.mulf %43, %45 : vector<16x128xf32>
    %47 = arith.addf %23, %46 : vector<16x128xf32>
    %c0_34 = arith.constant 0 : index
    %c6 = arith.constant 6 : index
    %c0_35 = arith.constant 0 : index
    %48 = vector.load %arg6[%c0_34, %c6, %c0_35] : memref<9x24x128xf32, #tpu.memory_space<vmem>>, vector<1x16x128xf32>
    %49 = vector.shape_cast %48 : vector<1x16x128xf32> to vector<16x128xf32>
    %c54 = arith.constant 54 : index
    %c0_36 = arith.constant 0 : index
    %c0_37 = arith.constant 0 : index
    %50 = vector.load %arg3[%c54, %c0_36, %c0_37] : memref<81x16x128xf32, #tpu.memory_space<vmem>>, vector<1x16x128xf32>
    %51 = vector.shape_cast %50 : vector<1x16x128xf32> to vector<16x128xf32>
    %52 = arith.mulf %49, %51 : vector<16x128xf32>
    %53 = arith.addf %29, %52 : vector<16x128xf32>
    %c0_38 = arith.constant 0 : index
    %c7 = arith.constant 7 : index
    %c0_39 = arith.constant 0 : index
    %54 = vector.load %arg6[%c0_38, %c7, %c0_39] : memref<9x24x128xf32, #tpu.memory_space<vmem>>, vector<1x16x128xf32>
    %55 = vector.shape_cast %54 : vector<1x16x128xf32> to vector<16x128xf32>
    %c63 = arith.constant 63 : index
    %c0_40 = arith.constant 0 : index
    %c0_41 = arith.constant 0 : index
    %56 = vector.load %arg3[%c63, %c0_40, %c0_41] : memref<81x16x128xf32, #tpu.memory_space<vmem>>, vector<1x16x128xf32>
    %57 = vector.shape_cast %56 : vector<1x16x128xf32> to vector<16x128xf32>
    %58 = arith.mulf %55, %57 : vector<16x128xf32>
    %59 = arith.addf %35, %58 : vector<16x128xf32>
    %c0_42 = arith.constant 0 : index
    %c8 = arith.constant 8 : index
    %c0_43 = arith.constant 0 : index
    %60 = vector.load %arg6[%c0_42, %c8, %c0_43] : memref<9x24x128xf32, #tpu.memory_space<vmem>>, vector<1x16x128xf32>
    %61 = vector.shape_cast %60 : vector<1x16x128xf32> to vector<16x128xf32>
    %c72 = arith.constant 72 : index
    %c0_44 = arith.constant 0 : index
    %c0_45 = arith.constant 0 : index
    %62 = vector.load %arg3[%c72, %c0_44, %c0_45] : memref<81x16x128xf32, #tpu.memory_space<vmem>>, vector<1x16x128xf32>
    %63 = vector.shape_cast %62 : vector<1x16x128xf32> to vector<16x128xf32>
    %64 = arith.mulf %61, %63 : vector<16x128xf32>
    %65 = arith.addf %41, %64 : vector<16x128xf32>
    %c0_46 = arith.constant 0 : index
    %66 = arith.index_cast %1 : i32 to index
    %c8_47 = arith.constant 8 : index
    %67 = vector.load %arg2[%c0_46, %66, %c8_47] : memref<1x24x192xf32, #tpu.memory_space<vmem>>, vector<1x24x128xf32>
    %68 = vector.shape_cast %67 : vector<1x24x128xf32> to vector<24x128xf32>
    %c1_48 = arith.constant 1 : index
    %c0_49 = arith.constant 0 : index
    %c0_50 = arith.constant 0 : index
    %69 = vector.load %arg6[%c1_48, %c0_49, %c0_50] : memref<9x24x128xf32, #tpu.memory_space<vmem>>, vector<1x24x128xf32>
    %70 = vector.shape_cast %69 : vector<1x24x128xf32> to vector<24x128xf32>
    %71 = vector.shape_cast %68 : vector<24x128xf32> to vector<1x24x128xf32>
    tpu.vector_store %arg6[%c1_48, %c0_49, %c0_50], %71 {strides = array<i32>} : memref<9x24x128xf32, #tpu.memory_space<vmem>>, vector<1x24x128xf32>,
    %c1_51 = arith.constant 1 : index
    %c0_52 = arith.constant 0 : index
    %c0_53 = arith.constant 0 : index
    %72 = vector.load %arg6[%c1_51, %c0_52, %c0_53] : memref<9x24x128xf32, #tpu.memory_space<vmem>>, vector<1x16x128xf32>
    %73 = vector.shape_cast %72 : vector<1x16x128xf32> to vector<16x128xf32>
    %c1_54 = arith.constant 1 : index
    %c0_55 = arith.constant 0 : index
    %c0_56 = arith.constant 0 : index
    %74 = vector.load %arg3[%c1_54, %c0_55, %c0_56] : memref<81x16x128xf32, #tpu.memory_space<vmem>>, vector<1x16x128xf32>
    %75 = vector.shape_cast %74 : vector<1x16x128xf32> to vector<16x128xf32>
    %76 = arith.mulf %73, %75 : vector<16x128xf32>
    %77 = arith.addf %47, %76 : vector<16x128xf32>
    %c1_57 = arith.constant 1 : index
    %c1_58 = arith.constant 1 : index
    %c0_59 = arith.constant 0 : index
    %78 = vector.load %arg6[%c1_57, %c1_58, %c0_59] : memref<9x24x128xf32, #tpu.memory_space<vmem>>, vector<1x16x128xf32>
    %79 = vector.shape_cast %78 : vector<1x16x128xf32> to vector<16x128xf32>
    %c10 = arith.constant 10 : index
    %c0_60 = arith.constant 0 : index
    %c0_61 = arith.constant 0 : index
    %80 = vector.load %arg3[%c10, %c0_60, %c0_61] : memref<81x16x128xf32, #tpu.memory_space<vmem>>, vector<1x16x128xf32>
    %81 = vector.shape_cast %80 : vector<1x16x128xf32> to vector<16x128xf32>
    %82 = arith.mulf %79, %81 : vector<16x128xf32>
    %83 = arith.addf %53, %82 : vector<16x128xf32>
    %c1_62 = arith.constant 1 : index
    %c2_63 = arith.constant 2 : index
    %c0_64 = arith.constant 0 : index
    %84 = vector.load %arg6[%c1_62, %c2_63, %c0_64] : memref<9x24x128xf32, #tpu.memory_space<vmem>>, vector<1x16x128xf32>
    %85 = vector.shape_cast %84 : vector<1x16x128xf32> to vector<16x128xf32>
    %c19 = arith.constant 19 : index
    %c0_65 = arith.constant 0 : index
    %c0_66 = arith.constant 0 : index
    %86 = vector.load %arg3[%c19, %c0_65, %c0_66] : memref<81x16x128xf32, #tpu.memory_space<vmem>>, vector<1x16x128xf32>
    %87 = vector.shape_cast %86 : vector<1x16x128xf32> to vector<16x128xf32>
    %88 = arith.mulf %85, %87 : vector<16x128xf32>
    %89 = arith.addf %59, %88 : vector<16x128xf32>
    %c1_67 = arith.constant 1 : index
    %c3_68 = arith.constant 3 : index
    %c0_69 = arith.constant 0 : index
    %90 = vector.load %arg6[%c1_67, %c3_68, %c0_69] : memref<9x24x128xf32, #tpu.memory_space<vmem>>, vector<1x16x128xf32>
    %91 = vector.shape_cast %90 : vector<1x16x128xf32> to vector<16x128xf32>
    %c28 = arith.constant 28 : index
    %c0_70 = arith.constant 0 : index
    %c0_71 = arith.constant 0 : index
    %92 = vector.load %arg3[%c28, %c0_70, %c0_71] : memref<81x16x128xf32, #tpu.memory_space<vmem>>, vector<1x16x128xf32>
    %93 = vector.shape_cast %92 : vector<1x16x128xf32> to vector<16x128xf32>
    %94 = arith.mulf %91, %93 : vector<16x128xf32>
    %95 = arith.addf %65, %94 : vector<16x128xf32>
    %c1_72 = arith.constant 1 : index
    %c4_73 = arith.constant 4 : index
    %c0_74 = arith.constant 0 : index
    %96 = vector.load %arg6[%c1_72, %c4_73, %c0_74] : memref<9x24x128xf32, #tpu.memory_space<vmem>>, vector<1x16x128xf32>
    %97 = vector.shape_cast %96 : vector<1x16x128xf32> to vector<16x128xf32>
    %c37 = arith.constant 37 : index
    %c0_75 = arith.constant 0 : index
    %c0_76 = arith.constant 0 : index
    %98 = vector.load %arg3[%c37, %c0_75, %c0_76] : memref<81x16x128xf32, #tpu.memory_space<vmem>>, vector<1x16x128xf32>
    %99 = vector.shape_cast %98 : vector<1x16x128xf32> to vector<16x128xf32>
    %100 = arith.mulf %97, %99 : vector<16x128xf32>
    %101 = arith.addf %77, %100 : vector<16x128xf32>
    %c1_77 = arith.constant 1 : index
    %c5_78 = arith.constant 5 : index
    %c0_79 = arith.constant 0 : index
    %102 = vector.load %arg6[%c1_77, %c5_78, %c0_79] : memref<9x24x128xf32, #tpu.memory_space<vmem>>, vector<1x16x128xf32>
    %103 = vector.shape_cast %102 : vector<1x16x128xf32> to vector<16x128xf32>
    %c46 = arith.constant 46 : index
    %c0_80 = arith.constant 0 : index
    %c0_81 = arith.constant 0 : index
    %104 = vector.load %arg3[%c46, %c0_80, %c0_81] : memref<81x16x128xf32, #tpu.memory_space<vmem>>, vector<1x16x128xf32>
    %105 = vector.shape_cast %104 : vector<1x16x128xf32> to vector<16x128xf32>
    %106 = arith.mulf %103, %105 : vector<16x128xf32>
    %107 = arith.addf %83, %106 : vector<16x128xf32>
    %c1_82 = arith.constant 1 : index
    %c6_83 = arith.constant 6 : index
    %c0_84 = arith.constant 0 : index
    %108 = vector.load %arg6[%c1_82, %c6_83, %c0_84] : memref<9x24x128xf32, #tpu.memory_space<vmem>>, vector<1x16x128xf32>
    %109 = vector.shape_cast %108 : vector<1x16x128xf32> to vector<16x128xf32>
    %c55 = arith.constant 55 : index
    %c0_85 = arith.constant 0 : index
    %c0_86 = arith.constant 0 : index
    %110 = vector.load %arg3[%c55, %c0_85, %c0_86] : memref<81x16x128xf32, #tpu.memory_space<vmem>>, vector<1x16x128xf32>
    %111 = vector.shape_cast %110 : vector<1x16x128xf32> to vector<16x128xf32>
    %112 = arith.mulf %109, %111 : vector<16x128xf32>
    %113 = arith.addf %89, %112 : vector<16x128xf32>
    %c1_87 = arith.constant 1 : index
    %c7_88 = arith.constant 7 : index
    %c0_89 = arith.constant 0 : index
    %114 = vector.load %arg6[%c1_87, %c7_88, %c0_89] : memref<9x24x128xf32, #tpu.memory_space<vmem>>, vector<1x16x128xf32>
    %115 = vector.shape_cast %114 : vector<1x16x128xf32> to vector<16x128xf32>
    %c64 = arith.constant 64 : index
    %c0_90 = arith.constant 0 : index
    %c0_91 = arith.constant 0 : index
    %116 = vector.load %arg3[%c64, %c0_90, %c0_91] : memref<81x16x128xf32, #tpu.memory_space<vmem>>, vector<1x16x128xf32>
    %117 = vector.shape_cast %116 : vector<1x16x128xf32> to vector<16x128xf32>
    %118 = arith.mulf %115, %117 : vector<16x128xf32>
    %119 = arith.addf %95, %118 : vector<16x128xf32>
    %c1_92 = arith.constant 1 : index
    %c8_93 = arith.constant 8 : index
    %c0_94 = arith.constant 0 : index
    %120 = vector.load %arg6[%c1_92, %c8_93, %c0_94] : memref<9x24x128xf32, #tpu.memory_space<vmem>>, vector<1x16x128xf32>
    %121 = vector.shape_cast %120 : vector<1x16x128xf32> to vector<16x128xf32>
    %c73 = arith.constant 73 : index
    %c0_95 = arith.constant 0 : index
    %c0_96 = arith.constant 0 : index
    %122 = vector.load %arg3[%c73, %c0_95, %c0_96] : memref<81x16x128xf32, #tpu.memory_space<vmem>>, vector<1x16x128xf32>
    %123 = vector.shape_cast %122 : vector<1x16x128xf32> to vector<16x128xf32>
    %124 = arith.mulf %121, %123 : vector<16x128xf32>
    %125 = arith.addf %101, %124 : vector<16x128xf32>
    %c0_97 = arith.constant 0 : index
    %126 = arith.index_cast %1 : i32 to index
    %c16 = arith.constant 16 : index
    %127 = vector.load %arg2[%c0_97, %126, %c16] : memref<1x24x192xf32, #tpu.memory_space<vmem>>, vector<1x24x128xf32>
    %128 = vector.shape_cast %127 : vector<1x24x128xf32> to vector<24x128xf32>
    %c2_98 = arith.constant 2 : index
    %c0_99 = arith.constant 0 : index
    %c0_100 = arith.constant 0 : index
    %129 = vector.load %arg6[%c2_98, %c0_99, %c0_100] : memref<9x24x128xf32, #tpu.memory_space<vmem>>, vector<1x24x128xf32>
    %130 = vector.shape_cast %129 : vector<1x24x128xf32> to vector<24x128xf32>
    %131 = vector.shape_cast %128 : vector<24x128xf32> to vector<1x24x128xf32>
    tpu.vector_store %arg6[%c2_98, %c0_99, %c0_100], %131 {strides = array<i32>} : memref<9x24x128xf32, #tpu.memory_space<vmem>>, vector<1x24x128xf32>,
    %c2_101 = arith.constant 2 : index
    %c0_102 = arith.constant 0 : index
    %c0_103 = arith.constant 0 : index
    %132 = vector.load %arg6[%c2_101, %c0_102, %c0_103] : memref<9x24x128xf32, #tpu.memory_space<vmem>>, vector<1x16x128xf32>
    %133 = vector.shape_cast %132 : vector<1x16x128xf32> to vector<16x128xf32>
    %c2_104 = arith.constant 2 : index
    %c0_105 = arith.constant 0 : index
    %c0_106 = arith.constant 0 : index
    %134 = vector.load %arg3[%c2_104, %c0_105, %c0_106] : memref<81x16x128xf32, #tpu.memory_space<vmem>>, vector<1x16x128xf32>
    %135 = vector.shape_cast %134 : vector<1x16x128xf32> to vector<16x128xf32>
    %136 = arith.mulf %133, %135 : vector<16x128xf32>
    %137 = arith.addf %107, %136 : vector<16x128xf32>
    %c2_107 = arith.constant 2 : index
    %c1_108 = arith.constant 1 : index
    %c0_109 = arith.constant 0 : index
    %138 = vector.load %arg6[%c2_107, %c1_108, %c0_109] : memref<9x24x128xf32, #tpu.memory_space<vmem>>, vector<1x16x128xf32>
    %139 = vector.shape_cast %138 : vector<1x16x128xf32> to vector<16x128xf32>
    %c11 = arith.constant 11 : index
    %c0_110 = arith.constant 0 : index
    %c0_111 = arith.constant 0 : index
    %140 = vector.load %arg3[%c11, %c0_110, %c0_111] : memref<81x16x128xf32, #tpu.memory_space<vmem>>, vector<1x16x128xf32>
    %141 = vector.shape_cast %140 : vector<1x16x128xf32> to vector<16x128xf32>
    %142 = arith.mulf %139, %141 : vector<16x128xf32>
    %143 = arith.addf %113, %142 : vector<16x128xf32>
    %c2_112 = arith.constant 2 : index
    %c2_113 = arith.constant 2 : index
    %c0_114 = arith.constant 0 : index
    %144 = vector.load %arg6[%c2_112, %c2_113, %c0_114] : memref<9x24x128xf32, #tpu.memory_space<vmem>>, vector<1x16x128xf32>
    %145 = vector.shape_cast %144 : vector<1x16x128xf32> to vector<16x128xf32>
    %c20 = arith.constant 20 : index
    %c0_115 = arith.constant 0 : index
    %c0_116 = arith.constant 0 : index
    %146 = vector.load %arg3[%c20, %c0_115, %c0_116] : memref<81x16x128xf32, #tpu.memory_space<vmem>>, vector<1x16x128xf32>
    %147 = vector.shape_cast %146 : vector<1x16x128xf32> to vector<16x128xf32>
    %148 = arith.mulf %145, %147 : vector<16x128xf32>
    %149 = arith.addf %119, %148 : vector<16x128xf32>
    %c2_117 = arith.constant 2 : index
    %c3_118 = arith.constant 3 : index
    %c0_119 = arith.constant 0 : index
    %150 = vector.load %arg6[%c2_117, %c3_118, %c0_119] : memref<9x24x128xf32, #tpu.memory_space<vmem>>, vector<1x16x128xf32>
    %151 = vector.shape_cast %150 : vector<1x16x128xf32> to vector<16x128xf32>
    %c29 = arith.constant 29 : index
    %c0_120 = arith.constant 0 : index
    %c0_121 = arith.constant 0 : index
    %152 = vector.load %arg3[%c29, %c0_120, %c0_121] : memref<81x16x128xf32, #tpu.memory_space<vmem>>, vector<1x16x128xf32>
    %153 = vector.shape_cast %152 : vector<1x16x128xf32> to vector<16x128xf32>
    %154 = arith.mulf %151, %153 : vector<16x128xf32>
    %155 = arith.addf %125, %154 : vector<16x128xf32>
    %c2_122 = arith.constant 2 : index
    %c4_123 = arith.constant 4 : index
    %c0_124 = arith.constant 0 : index
    %156 = vector.load %arg6[%c2_122, %c4_123, %c0_124] : memref<9x24x128xf32, #tpu.memory_space<vmem>>, vector<1x16x128xf32>
    %157 = vector.shape_cast %156 : vector<1x16x128xf32> to vector<16x128xf32>
    %c38 = arith.constant 38 : index
    %c0_125 = arith.constant 0 : index
    %c0_126 = arith.constant 0 : index
    %158 = vector.load %arg3[%c38, %c0_125, %c0_126] : memref<81x16x128xf32, #tpu.memory_space<vmem>>, vector<1x16x128xf32>
    %159 = vector.shape_cast %158 : vector<1x16x128xf32> to vector<16x128xf32>
    %160 = arith.mulf %157, %159 : vector<16x128xf32>
    %161 = arith.addf %137, %160 : vector<16x128xf32>
    %c2_127 = arith.constant 2 : index
    %c5_128 = arith.constant 5 : index
    %c0_129 = arith.constant 0 : index
    %162 = vector.load %arg6[%c2_127, %c5_128, %c0_129] : memref<9x24x128xf32, #tpu.memory_space<vmem>>, vector<1x16x128xf32>
    %163 = vector.shape_cast %162 : vector<1x16x128xf32> to vector<16x128xf32>
    %c47 = arith.constant 47 : index
    %c0_130 = arith.constant 0 : index
    %c0_131 = arith.constant 0 : index
    %164 = vector.load %arg3[%c47, %c0_130, %c0_131] : memref<81x16x128xf32, #tpu.memory_space<vmem>>, vector<1x16x128xf32>
    %165 = vector.shape_cast %164 : vector<1x16x128xf32> to vector<16x128xf32>
    %166 = arith.mulf %163, %165 : vector<16x128xf32>
    %167 = arith.addf %143, %166 : vector<16x128xf32>
    %c2_132 = arith.constant 2 : index
    %c6_133 = arith.constant 6 : index
    %c0_134 = arith.constant 0 : index
    %168 = vector.load %arg6[%c2_132, %c6_133, %c0_134] : memref<9x24x128xf32, #tpu.memory_space<vmem>>, vector<1x16x128xf32>
    %169 = vector.shape_cast %168 : vector<1x16x128xf32> to vector<16x128xf32>
    %c56 = arith.constant 56 : index
    %c0_135 = arith.constant 0 : index
    %c0_136 = arith.constant 0 : index
    %170 = vector.load %arg3[%c56, %c0_135, %c0_136] : memref<81x16x128xf32, #tpu.memory_space<vmem>>, vector<1x16x128xf32>
    %171 = vector.shape_cast %170 : vector<1x16x128xf32> to vector<16x128xf32>
    %172 = arith.mulf %169, %171 : vector<16x128xf32>
    %173 = arith.addf %149, %172 : vector<16x128xf32>
    %c2_137 = arith.constant 2 : index
    %c7_138 = arith.constant 7 : index
    %c0_139 = arith.constant 0 : index
    %174 = vector.load %arg6[%c2_137, %c7_138, %c0_139] : memref<9x24x128xf32, #tpu.memory_space<vmem>>, vector<1x16x128xf32>
    %175 = vector.shape_cast %174 : vector<1x16x128xf32> to vector<16x128xf32>
    %c65 = arith.constant 65 : index
    %c0_140 = arith.constant 0 : index
    %c0_141 = arith.constant 0 : index
    %176 = vector.load %arg3[%c65, %c0_140, %c0_141] : memref<81x16x128xf32, #tpu.memory_space<vmem>>, vector<1x16x128xf32>
    %177 = vector.shape_cast %176 : vector<1x16x128xf32> to vector<16x128xf32>
    %178 = arith.mulf %175, %177 : vector<16x128xf32>
    %179 = arith.addf %155, %178 : vector<16x128xf32>
    %c2_142 = arith.constant 2 : index
    %c8_143 = arith.constant 8 : index
    %c0_144 = arith.constant 0 : index
    %180 = vector.load %arg6[%c2_142, %c8_143, %c0_144] : memref<9x24x128xf32, #tpu.memory_space<vmem>>, vector<1x16x128xf32>
    %181 = vector.shape_cast %180 : vector<1x16x128xf32> to vector<16x128xf32>
    %c74 = arith.constant 74 : index
    %c0_145 = arith.constant 0 : index
    %c0_146 = arith.constant 0 : index
    %182 = vector.load %arg3[%c74, %c0_145, %c0_146] : memref<81x16x128xf32, #tpu.memory_space<vmem>>, vector<1x16x128xf32>
    %183 = vector.shape_cast %182 : vector<1x16x128xf32> to vector<16x128xf32>
    %184 = arith.mulf %181, %183 : vector<16x128xf32>
    %185 = arith.addf %161, %184 : vector<16x128xf32>
    %c0_147 = arith.constant 0 : index
    %186 = arith.index_cast %1 : i32 to index
    %c24 = arith.constant 24 : index
    %187 = vector.load %arg2[%c0_147, %186, %c24] : memref<1x24x192xf32, #tpu.memory_space<vmem>>, vector<1x24x128xf32>
    %188 = vector.shape_cast %187 : vector<1x24x128xf32> to vector<24x128xf32>
    %c3_148 = arith.constant 3 : index
    %c0_149 = arith.constant 0 : index
    %c0_150 = arith.constant 0 : index
    %189 = vector.load %arg6[%c3_148, %c0_149, %c0_150] : memref<9x24x128xf32, #tpu.memory_space<vmem>>, vector<1x24x128xf32>
    %190 = vector.shape_cast %189 : vector<1x24x128xf32> to vector<24x128xf32>
    %191 = vector.shape_cast %188 : vector<24x128xf32> to vector<1x24x128xf32>
    tpu.vector_store %arg6[%c3_148, %c0_149, %c0_150], %191 {strides = array<i32>} : memref<9x24x128xf32, #tpu.memory_space<vmem>>, vector<1x24x128xf32>,
    %c3_151 = arith.constant 3 : index
    %c0_152 = arith.constant 0 : index
    %c0_153 = arith.constant 0 : index
    %192 = vector.load %arg6[%c3_151, %c0_152, %c0_153] : memref<9x24x128xf32, #tpu.memory_space<vmem>>, vector<1x16x128xf32>
    %193 = vector.shape_cast %192 : vector<1x16x128xf32> to vector<16x128xf32>
    %c3_154 = arith.constant 3 : index
    %c0_155 = arith.constant 0 : index
    %c0_156 = arith.constant 0 : index
    %194 = vector.load %arg3[%c3_154, %c0_155, %c0_156] : memref<81x16x128xf32, #tpu.memory_space<vmem>>, vector<1x16x128xf32>
    %195 = vector.shape_cast %194 : vector<1x16x128xf32> to vector<16x128xf32>
    %196 = arith.mulf %193, %195 : vector<16x128xf32>
    %197 = arith.addf %167, %196 : vector<16x128xf32>
    %c3_157 = arith.constant 3 : index
    %c1_158 = arith.constant 1 : index
    %c0_159 = arith.constant 0 : index
    %198 = vector.load %arg6[%c3_157, %c1_158, %c0_159] : memref<9x24x128xf32, #tpu.memory_space<vmem>>, vector<1x16x128xf32>
    %199 = vector.shape_cast %198 : vector<1x16x128xf32> to vector<16x128xf32>
    %c12 = arith.constant 12 : index
    %c0_160 = arith.constant 0 : index
    %c0_161 = arith.constant 0 : index
    %200 = vector.load %arg3[%c12, %c0_160, %c0_161] : memref<81x16x128xf32, #tpu.memory_space<vmem>>, vector<1x16x128xf32>
    %201 = vector.shape_cast %200 : vector<1x16x128xf32> to vector<16x128xf32>
    %202 = arith.mulf %199, %201 : vector<16x128xf32>
    %203 = arith.addf %173, %202 : vector<16x128xf32>
    %c3_162 = arith.constant 3 : index
    %c2_163 = arith.constant 2 : index
    %c0_164 = arith.constant 0 : index
    %204 = vector.load %arg6[%c3_162, %c2_163, %c0_164] : memref<9x24x128xf32, #tpu.memory_space<vmem>>, vector<1x16x128xf32>
    %205 = vector.shape_cast %204 : vector<1x16x128xf32> to vector<16x128xf32>
    %c21 = arith.constant 21 : index
    %c0_165 = arith.constant 0 : index
    %c0_166 = arith.constant 0 : index
    %206 = vector.load %arg3[%c21, %c0_165, %c0_166] : memref<81x16x128xf32, #tpu.memory_space<vmem>>, vector<1x16x128xf32>
    %207 = vector.shape_cast %206 : vector<1x16x128xf32> to vector<16x128xf32>
    %208 = arith.mulf %205, %207 : vector<16x128xf32>
    %209 = arith.addf %179, %208 : vector<16x128xf32>
    %c3_167 = arith.constant 3 : index
    %c3_168 = arith.constant 3 : index
    %c0_169 = arith.constant 0 : index
    %210 = vector.load %arg6[%c3_167, %c3_168, %c0_169] : memref<9x24x128xf32, #tpu.memory_space<vmem>>, vector<1x16x128xf32>
    %211 = vector.shape_cast %210 : vector<1x16x128xf32> to vector<16x128xf32>
    %c30 = arith.constant 30 : index
    %c0_170 = arith.constant 0 : index
    %c0_171 = arith.constant 0 : index
    %212 = vector.load %arg3[%c30, %c0_170, %c0_171] : memref<81x16x128xf32, #tpu.memory_space<vmem>>, vector<1x16x128xf32>
    %213 = vector.shape_cast %212 : vector<1x16x128xf32> to vector<16x128xf32>
    %214 = arith.mulf %211, %213 : vector<16x128xf32>
    %215 = arith.addf %185, %214 : vector<16x128xf32>
    %c3_172 = arith.constant 3 : index
    %c4_173 = arith.constant 4 : index
    %c0_174 = arith.constant 0 : index
    %216 = vector.load %arg6[%c3_172, %c4_173, %c0_174] : memref<9x24x128xf32, #tpu.memory_space<vmem>>, vector<1x16x128xf32>
    %217 = vector.shape_cast %216 : vector<1x16x128xf32> to vector<16x128xf32>
    %c39 = arith.constant 39 : index
    %c0_175 = arith.constant 0 : index
    %c0_176 = arith.constant 0 : index
    %218 = vector.load %arg3[%c39, %c0_175, %c0_176] : memref<81x16x128xf32, #tpu.memory_space<vmem>>, vector<1x16x128xf32>
    %219 = vector.shape_cast %218 : vector<1x16x128xf32> to vector<16x128xf32>
    %220 = arith.mulf %217, %219 : vector<16x128xf32>
    %221 = arith.addf %197, %220 : vector<16x128xf32>
    %c3_177 = arith.constant 3 : index
    %c5_178 = arith.constant 5 : index
    %c0_179 = arith.constant 0 : index
    %222 = vector.load %arg6[%c3_177, %c5_178, %c0_179] : memref<9x24x128xf32, #tpu.memory_space<vmem>>, vector<1x16x128xf32>
    %223 = vector.shape_cast %222 : vector<1x16x128xf32> to vector<16x128xf32>
    %c48 = arith.constant 48 : index
    %c0_180 = arith.constant 0 : index
    %c0_181 = arith.constant 0 : index
    %224 = vector.load %arg3[%c48, %c0_180, %c0_181] : memref<81x16x128xf32, #tpu.memory_space<vmem>>, vector<1x16x128xf32>
    %225 = vector.shape_cast %224 : vector<1x16x128xf32> to vector<16x128xf32>
    %226 = arith.mulf %223, %225 : vector<16x128xf32>
    %227 = arith.addf %203, %226 : vector<16x128xf32>
    %c3_182 = arith.constant 3 : index
    %c6_183 = arith.constant 6 : index
    %c0_184 = arith.constant 0 : index
    %228 = vector.load %arg6[%c3_182, %c6_183, %c0_184] : memref<9x24x128xf32, #tpu.memory_space<vmem>>, vector<1x16x128xf32>
    %229 = vector.shape_cast %228 : vector<1x16x128xf32> to vector<16x128xf32>
    %c57 = arith.constant 57 : index
    %c0_185 = arith.constant 0 : index
    %c0_186 = arith.constant 0 : index
    %230 = vector.load %arg3[%c57, %c0_185, %c0_186] : memref<81x16x128xf32, #tpu.memory_space<vmem>>, vector<1x16x128xf32>
    %231 = vector.shape_cast %230 : vector<1x16x128xf32> to vector<16x128xf32>
    %232 = arith.mulf %229, %231 : vector<16x128xf32>
    %233 = arith.addf %209, %232 : vector<16x128xf32>
    %c3_187 = arith.constant 3 : index
    %c7_188 = arith.constant 7 : index
    %c0_189 = arith.constant 0 : index
    %234 = vector.load %arg6[%c3_187, %c7_188, %c0_189] : memref<9x24x128xf32, #tpu.memory_space<vmem>>, vector<1x16x128xf32>
    %235 = vector.shape_cast %234 : vector<1x16x128xf32> to vector<16x128xf32>
    %c66 = arith.constant 66 : index
    %c0_190 = arith.constant 0 : index
    %c0_191 = arith.constant 0 : index
    %236 = vector.load %arg3[%c66, %c0_190, %c0_191] : memref<81x16x128xf32, #tpu.memory_space<vmem>>, vector<1x16x128xf32>
    %237 = vector.shape_cast %236 : vector<1x16x128xf32> to vector<16x128xf32>
    %238 = arith.mulf %235, %237 : vector<16x128xf32>
    %239 = arith.addf %215, %238 : vector<16x128xf32>
    %c3_192 = arith.constant 3 : index
    %c8_193 = arith.constant 8 : index
    %c0_194 = arith.constant 0 : index
    %240 = vector.load %arg6[%c3_192, %c8_193, %c0_194] : memref<9x24x128xf32, #tpu.memory_space<vmem>>, vector<1x16x128xf32>
    %241 = vector.shape_cast %240 : vector<1x16x128xf32> to vector<16x128xf32>
    %c75 = arith.constant 75 : index
    %c0_195 = arith.constant 0 : index
    %c0_196 = arith.constant 0 : index
    %242 = vector.load %arg3[%c75, %c0_195, %c0_196] : memref<81x16x128xf32, #tpu.memory_space<vmem>>, vector<1x16x128xf32>
    %243 = vector.shape_cast %242 : vector<1x16x128xf32> to vector<16x128xf32>
    %244 = arith.mulf %241, %243 : vector<16x128xf32>
    %245 = arith.addf %221, %244 : vector<16x128xf32>
    %c0_197 = arith.constant 0 : index
    %246 = arith.index_cast %1 : i32 to index
    %c32 = arith.constant 32 : index
    %247 = vector.load %arg2[%c0_197, %246, %c32] : memref<1x24x192xf32, #tpu.memory_space<vmem>>, vector<1x24x128xf32>
    %248 = vector.shape_cast %247 : vector<1x24x128xf32> to vector<24x128xf32>
    %c4_198 = arith.constant 4 : index
    %c0_199 = arith.constant 0 : index
    %c0_200 = arith.constant 0 : index
    %249 = vector.load %arg6[%c4_198, %c0_199, %c0_200] : memref<9x24x128xf32, #tpu.memory_space<vmem>>, vector<1x24x128xf32>
    %250 = vector.shape_cast %249 : vector<1x24x128xf32> to vector<24x128xf32>
    %251 = vector.shape_cast %248 : vector<24x128xf32> to vector<1x24x128xf32>
    tpu.vector_store %arg6[%c4_198, %c0_199, %c0_200], %251 {strides = array<i32>} : memref<9x24x128xf32, #tpu.memory_space<vmem>>, vector<1x24x128xf32>,
    %c4_201 = arith.constant 4 : index
    %c0_202 = arith.constant 0 : index
    %c0_203 = arith.constant 0 : index
    %252 = vector.load %arg6[%c4_201, %c0_202, %c0_203] : memref<9x24x128xf32, #tpu.memory_space<vmem>>, vector<1x16x128xf32>
    %253 = vector.shape_cast %252 : vector<1x16x128xf32> to vector<16x128xf32>
    %c4_204 = arith.constant 4 : index
    %c0_205 = arith.constant 0 : index
    %c0_206 = arith.constant 0 : index
    %254 = vector.load %arg3[%c4_204, %c0_205, %c0_206] : memref<81x16x128xf32, #tpu.memory_space<vmem>>, vector<1x16x128xf32>
    %255 = vector.shape_cast %254 : vector<1x16x128xf32> to vector<16x128xf32>
    %256 = arith.mulf %253, %255 : vector<16x128xf32>
    %257 = arith.addf %227, %256 : vector<16x128xf32>
    %c4_207 = arith.constant 4 : index
    %c1_208 = arith.constant 1 : index
    %c0_209 = arith.constant 0 : index
    %258 = vector.load %arg6[%c4_207, %c1_208, %c0_209] : memref<9x24x128xf32, #tpu.memory_space<vmem>>, vector<1x16x128xf32>
    %259 = vector.shape_cast %258 : vector<1x16x128xf32> to vector<16x128xf32>
    %c13 = arith.constant 13 : index
    %c0_210 = arith.constant 0 : index
    %c0_211 = arith.constant 0 : index
    %260 = vector.load %arg3[%c13, %c0_210, %c0_211] : memref<81x16x128xf32, #tpu.memory_space<vmem>>, vector<1x16x128xf32>
    %261 = vector.shape_cast %260 : vector<1x16x128xf32> to vector<16x128xf32>
    %262 = arith.mulf %259, %261 : vector<16x128xf32>
    %263 = arith.addf %233, %262 : vector<16x128xf32>
    %c4_212 = arith.constant 4 : index
    %c2_213 = arith.constant 2 : index
    %c0_214 = arith.constant 0 : index
    %264 = vector.load %arg6[%c4_212, %c2_213, %c0_214] : memref<9x24x128xf32, #tpu.memory_space<vmem>>, vector<1x16x128xf32>
    %265 = vector.shape_cast %264 : vector<1x16x128xf32> to vector<16x128xf32>
    %c22 = arith.constant 22 : index
    %c0_215 = arith.constant 0 : index
    %c0_216 = arith.constant 0 : index
    %266 = vector.load %arg3[%c22, %c0_215, %c0_216] : memref<81x16x128xf32, #tpu.memory_space<vmem>>, vector<1x16x128xf32>
    %267 = vector.shape_cast %266 : vector<1x16x128xf32> to vector<16x128xf32>
    %268 = arith.mulf %265, %267 : vector<16x128xf32>
    %269 = arith.addf %239, %268 : vector<16x128xf32>
    %c4_217 = arith.constant 4 : index
    %c3_218 = arith.constant 3 : index
    %c0_219 = arith.constant 0 : index
    %270 = vector.load %arg6[%c4_217, %c3_218, %c0_219] : memref<9x24x128xf32, #tpu.memory_space<vmem>>, vector<1x16x128xf32>
    %271 = vector.shape_cast %270 : vector<1x16x128xf32> to vector<16x128xf32>
    %c31 = arith.constant 31 : index
    %c0_220 = arith.constant 0 : index
    %c0_221 = arith.constant 0 : index
    %272 = vector.load %arg3[%c31, %c0_220, %c0_221] : memref<81x16x128xf32, #tpu.memory_space<vmem>>, vector<1x16x128xf32>
    %273 = vector.shape_cast %272 : vector<1x16x128xf32> to vector<16x128xf32>
    %274 = arith.mulf %271, %273 : vector<16x128xf32>
    %275 = arith.addf %245, %274 : vector<16x128xf32>
    %c4_222 = arith.constant 4 : index
    %c4_223 = arith.constant 4 : index
    %c0_224 = arith.constant 0 : index
    %276 = vector.load %arg6[%c4_222, %c4_223, %c0_224] : memref<9x24x128xf32, #tpu.memory_space<vmem>>, vector<1x16x128xf32>
    %277 = vector.shape_cast %276 : vector<1x16x128xf32> to vector<16x128xf32>
    %c40 = arith.constant 40 : index
    %c0_225 = arith.constant 0 : index
    %c0_226 = arith.constant 0 : index
    %278 = vector.load %arg3[%c40, %c0_225, %c0_226] : memref<81x16x128xf32, #tpu.memory_space<vmem>>, vector<1x16x128xf32>
    %279 = vector.shape_cast %278 : vector<1x16x128xf32> to vector<16x128xf32>
    %280 = arith.mulf %277, %279 : vector<16x128xf32>
    %281 = arith.addf %257, %280 : vector<16x128xf32>
    %c4_227 = arith.constant 4 : index
    %c5_228 = arith.constant 5 : index
    %c0_229 = arith.constant 0 : index
    %282 = vector.load %arg6[%c4_227, %c5_228, %c0_229] : memref<9x24x128xf32, #tpu.memory_space<vmem>>, vector<1x16x128xf32>
    %283 = vector.shape_cast %282 : vector<1x16x128xf32> to vector<16x128xf32>
    %c49 = arith.constant 49 : index
    %c0_230 = arith.constant 0 : index
    %c0_231 = arith.constant 0 : index
    %284 = vector.load %arg3[%c49, %c0_230, %c0_231] : memref<81x16x128xf32, #tpu.memory_space<vmem>>, vector<1x16x128xf32>
    %285 = vector.shape_cast %284 : vector<1x16x128xf32> to vector<16x128xf32>
    %286 = arith.mulf %283, %285 : vector<16x128xf32>
    %287 = arith.addf %263, %286 : vector<16x128xf32>
    %c4_232 = arith.constant 4 : index
    %c6_233 = arith.constant 6 : index
    %c0_234 = arith.constant 0 : index
    %288 = vector.load %arg6[%c4_232, %c6_233, %c0_234] : memref<9x24x128xf32, #tpu.memory_space<vmem>>, vector<1x16x128xf32>
    %289 = vector.shape_cast %288 : vector<1x16x128xf32> to vector<16x128xf32>
    %c58 = arith.constant 58 : index
    %c0_235 = arith.constant 0 : index
    %c0_236 = arith.constant 0 : index
    %290 = vector.load %arg3[%c58, %c0_235, %c0_236] : memref<81x16x128xf32, #tpu.memory_space<vmem>>, vector<1x16x128xf32>
    %291 = vector.shape_cast %290 : vector<1x16x128xf32> to vector<16x128xf32>
    %292 = arith.mulf %289, %291 : vector<16x128xf32>
    %293 = arith.addf %269, %292 : vector<16x128xf32>
    %c4_237 = arith.constant 4 : index
    %c7_238 = arith.constant 7 : index
    %c0_239 = arith.constant 0 : index
    %294 = vector.load %arg6[%c4_237, %c7_238, %c0_239] : memref<9x24x128xf32, #tpu.memory_space<vmem>>, vector<1x16x128xf32>
    %295 = vector.shape_cast %294 : vector<1x16x128xf32> to vector<16x128xf32>
    %c67 = arith.constant 67 : index
    %c0_240 = arith.constant 0 : index
    %c0_241 = arith.constant 0 : index
    %296 = vector.load %arg3[%c67, %c0_240, %c0_241] : memref<81x16x128xf32, #tpu.memory_space<vmem>>, vector<1x16x128xf32>
    %297 = vector.shape_cast %296 : vector<1x16x128xf32> to vector<16x128xf32>
    %298 = arith.mulf %295, %297 : vector<16x128xf32>
    %299 = arith.addf %275, %298 : vector<16x128xf32>
    %c4_242 = arith.constant 4 : index
    %c8_243 = arith.constant 8 : index
    %c0_244 = arith.constant 0 : index
    %300 = vector.load %arg6[%c4_242, %c8_243, %c0_244] : memref<9x24x128xf32, #tpu.memory_space<vmem>>, vector<1x16x128xf32>
    %301 = vector.shape_cast %300 : vector<1x16x128xf32> to vector<16x128xf32>
    %c76 = arith.constant 76 : index
    %c0_245 = arith.constant 0 : index
    %c0_246 = arith.constant 0 : index
    %302 = vector.load %arg3[%c76, %c0_245, %c0_246] : memref<81x16x128xf32, #tpu.memory_space<vmem>>, vector<1x16x128xf32>
    %303 = vector.shape_cast %302 : vector<1x16x128xf32> to vector<16x128xf32>
    %304 = arith.mulf %301, %303 : vector<16x128xf32>
    %305 = arith.addf %281, %304 : vector<16x128xf32>
    %c0_247 = arith.constant 0 : index
    %306 = arith.index_cast %1 : i32 to index
    %c40_248 = arith.constant 40 : index
    %307 = vector.load %arg2[%c0_247, %306, %c40_248] : memref<1x24x192xf32, #tpu.memory_space<vmem>>, vector<1x24x128xf32>
    %308 = vector.shape_cast %307 : vector<1x24x128xf32> to vector<24x128xf32>
    %c5_249 = arith.constant 5 : index
    %c0_250 = arith.constant 0 : index
    %c0_251 = arith.constant 0 : index
    %309 = vector.load %arg6[%c5_249, %c0_250, %c0_251] : memref<9x24x128xf32, #tpu.memory_space<vmem>>, vector<1x24x128xf32>
    %310 = vector.shape_cast %309 : vector<1x24x128xf32> to vector<24x128xf32>
    %311 = vector.shape_cast %308 : vector<24x128xf32> to vector<1x24x128xf32>
    tpu.vector_store %arg6[%c5_249, %c0_250, %c0_251], %311 {strides = array<i32>} : memref<9x24x128xf32, #tpu.memory_space<vmem>>, vector<1x24x128xf32>,
    %c5_252 = arith.constant 5 : index
    %c0_253 = arith.constant 0 : index
    %c0_254 = arith.constant 0 : index
    %312 = vector.load %arg6[%c5_252, %c0_253, %c0_254] : memref<9x24x128xf32, #tpu.memory_space<vmem>>, vector<1x16x128xf32>
    %313 = vector.shape_cast %312 : vector<1x16x128xf32> to vector<16x128xf32>
    %c5_255 = arith.constant 5 : index
    %c0_256 = arith.constant 0 : index
    %c0_257 = arith.constant 0 : index
    %314 = vector.load %arg3[%c5_255, %c0_256, %c0_257] : memref<81x16x128xf32, #tpu.memory_space<vmem>>, vector<1x16x128xf32>
    %315 = vector.shape_cast %314 : vector<1x16x128xf32> to vector<16x128xf32>
    %316 = arith.mulf %313, %315 : vector<16x128xf32>
    %317 = arith.addf %287, %316 : vector<16x128xf32>
    %c5_258 = arith.constant 5 : index
    %c1_259 = arith.constant 1 : index
    %c0_260 = arith.constant 0 : index
    %318 = vector.load %arg6[%c5_258, %c1_259, %c0_260] : memref<9x24x128xf32, #tpu.memory_space<vmem>>, vector<1x16x128xf32>
    %319 = vector.shape_cast %318 : vector<1x16x128xf32> to vector<16x128xf32>
    %c14 = arith.constant 14 : index
    %c0_261 = arith.constant 0 : index
    %c0_262 = arith.constant 0 : index
    %320 = vector.load %arg3[%c14, %c0_261, %c0_262] : memref<81x16x128xf32, #tpu.memory_space<vmem>>, vector<1x16x128xf32>
    %321 = vector.shape_cast %320 : vector<1x16x128xf32> to vector<16x128xf32>
    %322 = arith.mulf %319, %321 : vector<16x128xf32>
    %323 = arith.addf %293, %322 : vector<16x128xf32>
    %c5_263 = arith.constant 5 : index
    %c2_264 = arith.constant 2 : index
    %c0_265 = arith.constant 0 : index
    %324 = vector.load %arg6[%c5_263, %c2_264, %c0_265] : memref<9x24x128xf32, #tpu.memory_space<vmem>>, vector<1x16x128xf32>
    %325 = vector.shape_cast %324 : vector<1x16x128xf32> to vector<16x128xf32>
    %c23 = arith.constant 23 : index
    %c0_266 = arith.constant 0 : index
    %c0_267 = arith.constant 0 : index
    %326 = vector.load %arg3[%c23, %c0_266, %c0_267] : memref<81x16x128xf32, #tpu.memory_space<vmem>>, vector<1x16x128xf32>
    %327 = vector.shape_cast %326 : vector<1x16x128xf32> to vector<16x128xf32>
    %328 = arith.mulf %325, %327 : vector<16x128xf32>
    %329 = arith.addf %299, %328 : vector<16x128xf32>
    %c5_268 = arith.constant 5 : index
    %c3_269 = arith.constant 3 : index
    %c0_270 = arith.constant 0 : index
    %330 = vector.load %arg6[%c5_268, %c3_269, %c0_270] : memref<9x24x128xf32, #tpu.memory_space<vmem>>, vector<1x16x128xf32>
    %331 = vector.shape_cast %330 : vector<1x16x128xf32> to vector<16x128xf32>
    %c32_271 = arith.constant 32 : index
    %c0_272 = arith.constant 0 : index
    %c0_273 = arith.constant 0 : index
    %332 = vector.load %arg3[%c32_271, %c0_272, %c0_273] : memref<81x16x128xf32, #tpu.memory_space<vmem>>, vector<1x16x128xf32>
    %333 = vector.shape_cast %332 : vector<1x16x128xf32> to vector<16x128xf32>
    %334 = arith.mulf %331, %333 : vector<16x128xf32>
    %335 = arith.addf %305, %334 : vector<16x128xf32>
    %c5_274 = arith.constant 5 : index
    %c4_275 = arith.constant 4 : index
    %c0_276 = arith.constant 0 : index
    %336 = vector.load %arg6[%c5_274, %c4_275, %c0_276] : memref<9x24x128xf32, #tpu.memory_space<vmem>>, vector<1x16x128xf32>
    %337 = vector.shape_cast %336 : vector<1x16x128xf32> to vector<16x128xf32>
    %c41 = arith.constant 41 : index
    %c0_277 = arith.constant 0 : index
    %c0_278 = arith.constant 0 : index
    %338 = vector.load %arg3[%c41, %c0_277, %c0_278] : memref<81x16x128xf32, #tpu.memory_space<vmem>>, vector<1x16x128xf32>
    %339 = vector.shape_cast %338 : vector<1x16x128xf32> to vector<16x128xf32>
    %340 = arith.mulf %337, %339 : vector<16x128xf32>
    %341 = arith.addf %317, %340 : vector<16x128xf32>
    %c5_279 = arith.constant 5 : index
    %c5_280 = arith.constant 5 : index
    %c0_281 = arith.constant 0 : index
    %342 = vector.load %arg6[%c5_279, %c5_280, %c0_281] : memref<9x24x128xf32, #tpu.memory_space<vmem>>, vector<1x16x128xf32>
    %343 = vector.shape_cast %342 : vector<1x16x128xf32> to vector<16x128xf32>
    %c50 = arith.constant 50 : index
    %c0_282 = arith.constant 0 : index
    %c0_283 = arith.constant 0 : index
    %344 = vector.load %arg3[%c50, %c0_282, %c0_283] : memref<81x16x128xf32, #tpu.memory_space<vmem>>, vector<1x16x128xf32>
    %345 = vector.shape_cast %344 : vector<1x16x128xf32> to vector<16x128xf32>
    %346 = arith.mulf %343, %345 : vector<16x128xf32>
    %347 = arith.addf %323, %346 : vector<16x128xf32>
    %c5_284 = arith.constant 5 : index
    %c6_285 = arith.constant 6 : index
    %c0_286 = arith.constant 0 : index
    %348 = vector.load %arg6[%c5_284, %c6_285, %c0_286] : memref<9x24x128xf32, #tpu.memory_space<vmem>>, vector<1x16x128xf32>
    %349 = vector.shape_cast %348 : vector<1x16x128xf32> to vector<16x128xf32>
    %c59 = arith.constant 59 : index
    %c0_287 = arith.constant 0 : index
    %c0_288 = arith.constant 0 : index
    %350 = vector.load %arg3[%c59, %c0_287, %c0_288] : memref<81x16x128xf32, #tpu.memory_space<vmem>>, vector<1x16x128xf32>
    %351 = vector.shape_cast %350 : vector<1x16x128xf32> to vector<16x128xf32>
    %352 = arith.mulf %349, %351 : vector<16x128xf32>
    %353 = arith.addf %329, %352 : vector<16x128xf32>
    %c5_289 = arith.constant 5 : index
    %c7_290 = arith.constant 7 : index
    %c0_291 = arith.constant 0 : index
    %354 = vector.load %arg6[%c5_289, %c7_290, %c0_291] : memref<9x24x128xf32, #tpu.memory_space<vmem>>, vector<1x16x128xf32>
    %355 = vector.shape_cast %354 : vector<1x16x128xf32> to vector<16x128xf32>
    %c68 = arith.constant 68 : index
    %c0_292 = arith.constant 0 : index
    %c0_293 = arith.constant 0 : index
    %356 = vector.load %arg3[%c68, %c0_292, %c0_293] : memref<81x16x128xf32, #tpu.memory_space<vmem>>, vector<1x16x128xf32>
    %357 = vector.shape_cast %356 : vector<1x16x128xf32> to vector<16x128xf32>
    %358 = arith.mulf %355, %357 : vector<16x128xf32>
    %359 = arith.addf %335, %358 : vector<16x128xf32>
    %c5_294 = arith.constant 5 : index
    %c8_295 = arith.constant 8 : index
    %c0_296 = arith.constant 0 : index
    %360 = vector.load %arg6[%c5_294, %c8_295, %c0_296] : memref<9x24x128xf32, #tpu.memory_space<vmem>>, vector<1x16x128xf32>
    %361 = vector.shape_cast %360 : vector<1x16x128xf32> to vector<16x128xf32>
    %c77 = arith.constant 77 : index
    %c0_297 = arith.constant 0 : index
    %c0_298 = arith.constant 0 : index
    %362 = vector.load %arg3[%c77, %c0_297, %c0_298] : memref<81x16x128xf32, #tpu.memory_space<vmem>>, vector<1x16x128xf32>
    %363 = vector.shape_cast %362 : vector<1x16x128xf32> to vector<16x128xf32>
    %364 = arith.mulf %361, %363 : vector<16x128xf32>
    %365 = arith.addf %341, %364 : vector<16x128xf32>
    %c0_299 = arith.constant 0 : index
    %366 = arith.index_cast %1 : i32 to index
    %c48_300 = arith.constant 48 : index
    %367 = vector.load %arg2[%c0_299, %366, %c48_300] : memref<1x24x192xf32, #tpu.memory_space<vmem>>, vector<1x24x128xf32>
    %368 = vector.shape_cast %367 : vector<1x24x128xf32> to vector<24x128xf32>
    %c6_301 = arith.constant 6 : index
    %c0_302 = arith.constant 0 : index
    %c0_303 = arith.constant 0 : index
    %369 = vector.load %arg6[%c6_301, %c0_302, %c0_303] : memref<9x24x128xf32, #tpu.memory_space<vmem>>, vector<1x24x128xf32>
    %370 = vector.shape_cast %369 : vector<1x24x128xf32> to vector<24x128xf32>
    %371 = vector.shape_cast %368 : vector<24x128xf32> to vector<1x24x128xf32>
    tpu.vector_store %arg6[%c6_301, %c0_302, %c0_303], %371 {strides = array<i32>} : memref<9x24x128xf32, #tpu.memory_space<vmem>>, vector<1x24x128xf32>,
    %c6_304 = arith.constant 6 : index
    %c0_305 = arith.constant 0 : index
    %c0_306 = arith.constant 0 : index
    %372 = vector.load %arg6[%c6_304, %c0_305, %c0_306] : memref<9x24x128xf32, #tpu.memory_space<vmem>>, vector<1x16x128xf32>
    %373 = vector.shape_cast %372 : vector<1x16x128xf32> to vector<16x128xf32>
    %c6_307 = arith.constant 6 : index
    %c0_308 = arith.constant 0 : index
    %c0_309 = arith.constant 0 : index
    %374 = vector.load %arg3[%c6_307, %c0_308, %c0_309] : memref<81x16x128xf32, #tpu.memory_space<vmem>>, vector<1x16x128xf32>
    %375 = vector.shape_cast %374 : vector<1x16x128xf32> to vector<16x128xf32>
    %376 = arith.mulf %373, %375 : vector<16x128xf32>
    %377 = arith.addf %347, %376 : vector<16x128xf32>
    %c6_310 = arith.constant 6 : index
    %c1_311 = arith.constant 1 : index
    %c0_312 = arith.constant 0 : index
    %378 = vector.load %arg6[%c6_310, %c1_311, %c0_312] : memref<9x24x128xf32, #tpu.memory_space<vmem>>, vector<1x16x128xf32>
    %379 = vector.shape_cast %378 : vector<1x16x128xf32> to vector<16x128xf32>
    %c15 = arith.constant 15 : index
    %c0_313 = arith.constant 0 : index
    %c0_314 = arith.constant 0 : index
    %380 = vector.load %arg3[%c15, %c0_313, %c0_314] : memref<81x16x128xf32, #tpu.memory_space<vmem>>, vector<1x16x128xf32>
    %381 = vector.shape_cast %380 : vector<1x16x128xf32> to vector<16x128xf32>
    %382 = arith.mulf %379, %381 : vector<16x128xf32>
    %383 = arith.addf %353, %382 : vector<16x128xf32>
    %c6_315 = arith.constant 6 : index
    %c2_316 = arith.constant 2 : index
    %c0_317 = arith.constant 0 : index
    %384 = vector.load %arg6[%c6_315, %c2_316, %c0_317] : memref<9x24x128xf32, #tpu.memory_space<vmem>>, vector<1x16x128xf32>
    %385 = vector.shape_cast %384 : vector<1x16x128xf32> to vector<16x128xf32>
    %c24_318 = arith.constant 24 : index
    %c0_319 = arith.constant 0 : index
    %c0_320 = arith.constant 0 : index
    %386 = vector.load %arg3[%c24_318, %c0_319, %c0_320] : memref<81x16x128xf32, #tpu.memory_space<vmem>>, vector<1x16x128xf32>
    %387 = vector.shape_cast %386 : vector<1x16x128xf32> to vector<16x128xf32>
    %388 = arith.mulf %385, %387 : vector<16x128xf32>
    %389 = arith.addf %359, %388 : vector<16x128xf32>
    %c6_321 = arith.constant 6 : index
    %c3_322 = arith.constant 3 : index
    %c0_323 = arith.constant 0 : index
    %390 = vector.load %arg6[%c6_321, %c3_322, %c0_323] : memref<9x24x128xf32, #tpu.memory_space<vmem>>, vector<1x16x128xf32>
    %391 = vector.shape_cast %390 : vector<1x16x128xf32> to vector<16x128xf32>
    %c33 = arith.constant 33 : index
    %c0_324 = arith.constant 0 : index
    %c0_325 = arith.constant 0 : index
    %392 = vector.load %arg3[%c33, %c0_324, %c0_325] : memref<81x16x128xf32, #tpu.memory_space<vmem>>, vector<1x16x128xf32>
    %393 = vector.shape_cast %392 : vector<1x16x128xf32> to vector<16x128xf32>
    %394 = arith.mulf %391, %393 : vector<16x128xf32>
    %395 = arith.addf %365, %394 : vector<16x128xf32>
    %c6_326 = arith.constant 6 : index
    %c4_327 = arith.constant 4 : index
    %c0_328 = arith.constant 0 : index
    %396 = vector.load %arg6[%c6_326, %c4_327, %c0_328] : memref<9x24x128xf32, #tpu.memory_space<vmem>>, vector<1x16x128xf32>
    %397 = vector.shape_cast %396 : vector<1x16x128xf32> to vector<16x128xf32>
    %c42 = arith.constant 42 : index
    %c0_329 = arith.constant 0 : index
    %c0_330 = arith.constant 0 : index
    %398 = vector.load %arg3[%c42, %c0_329, %c0_330] : memref<81x16x128xf32, #tpu.memory_space<vmem>>, vector<1x16x128xf32>
    %399 = vector.shape_cast %398 : vector<1x16x128xf32> to vector<16x128xf32>
    %400 = arith.mulf %397, %399 : vector<16x128xf32>
    %401 = arith.addf %377, %400 : vector<16x128xf32>
    %c6_331 = arith.constant 6 : index
    %c5_332 = arith.constant 5 : index
    %c0_333 = arith.constant 0 : index
    %402 = vector.load %arg6[%c6_331, %c5_332, %c0_333] : memref<9x24x128xf32, #tpu.memory_space<vmem>>, vector<1x16x128xf32>
    %403 = vector.shape_cast %402 : vector<1x16x128xf32> to vector<16x128xf32>
    %c51 = arith.constant 51 : index
    %c0_334 = arith.constant 0 : index
    %c0_335 = arith.constant 0 : index
    %404 = vector.load %arg3[%c51, %c0_334, %c0_335] : memref<81x16x128xf32, #tpu.memory_space<vmem>>, vector<1x16x128xf32>
    %405 = vector.shape_cast %404 : vector<1x16x128xf32> to vector<16x128xf32>
    %406 = arith.mulf %403, %405 : vector<16x128xf32>
    %407 = arith.addf %383, %406 : vector<16x128xf32>
    %c6_336 = arith.constant 6 : index
    %c6_337 = arith.constant 6 : index
    %c0_338 = arith.constant 0 : index
    %408 = vector.load %arg6[%c6_336, %c6_337, %c0_338] : memref<9x24x128xf32, #tpu.memory_space<vmem>>, vector<1x16x128xf32>
    %409 = vector.shape_cast %408 : vector<1x16x128xf32> to vector<16x128xf32>
    %c60 = arith.constant 60 : index
    %c0_339 = arith.constant 0 : index
    %c0_340 = arith.constant 0 : index
    %410 = vector.load %arg3[%c60, %c0_339, %c0_340] : memref<81x16x128xf32, #tpu.memory_space<vmem>>, vector<1x16x128xf32>
    %411 = vector.shape_cast %410 : vector<1x16x128xf32> to vector<16x128xf32>
    %412 = arith.mulf %409, %411 : vector<16x128xf32>
    %413 = arith.addf %389, %412 : vector<16x128xf32>
    %c6_341 = arith.constant 6 : index
    %c7_342 = arith.constant 7 : index
    %c0_343 = arith.constant 0 : index
    %414 = vector.load %arg6[%c6_341, %c7_342, %c0_343] : memref<9x24x128xf32, #tpu.memory_space<vmem>>, vector<1x16x128xf32>
    %415 = vector.shape_cast %414 : vector<1x16x128xf32> to vector<16x128xf32>
    %c69 = arith.constant 69 : index
    %c0_344 = arith.constant 0 : index
    %c0_345 = arith.constant 0 : index
    %416 = vector.load %arg3[%c69, %c0_344, %c0_345] : memref<81x16x128xf32, #tpu.memory_space<vmem>>, vector<1x16x128xf32>
    %417 = vector.shape_cast %416 : vector<1x16x128xf32> to vector<16x128xf32>
    %418 = arith.mulf %415, %417 : vector<16x128xf32>
    %419 = arith.addf %395, %418 : vector<16x128xf32>
    %c6_346 = arith.constant 6 : index
    %c8_347 = arith.constant 8 : index
    %c0_348 = arith.constant 0 : index
    %420 = vector.load %arg6[%c6_346, %c8_347, %c0_348] : memref<9x24x128xf32, #tpu.memory_space<vmem>>, vector<1x16x128xf32>
    %421 = vector.shape_cast %420 : vector<1x16x128xf32> to vector<16x128xf32>
    %c78 = arith.constant 78 : index
    %c0_349 = arith.constant 0 : index
    %c0_350 = arith.constant 0 : index
    %422 = vector.load %arg3[%c78, %c0_349, %c0_350] : memref<81x16x128xf32, #tpu.memory_space<vmem>>, vector<1x16x128xf32>
    %423 = vector.shape_cast %422 : vector<1x16x128xf32> to vector<16x128xf32>
    %424 = arith.mulf %421, %423 : vector<16x128xf32>
    %425 = arith.addf %401, %424 : vector<16x128xf32>
    %c0_351 = arith.constant 0 : index
    %426 = arith.index_cast %1 : i32 to index
    %c56_352 = arith.constant 56 : index
    %427 = vector.load %arg2[%c0_351, %426, %c56_352] : memref<1x24x192xf32, #tpu.memory_space<vmem>>, vector<1x24x128xf32>
    %428 = vector.shape_cast %427 : vector<1x24x128xf32> to vector<24x128xf32>
    %c7_353 = arith.constant 7 : index
    %c0_354 = arith.constant 0 : index
    %c0_355 = arith.constant 0 : index
    %429 = vector.load %arg6[%c7_353, %c0_354, %c0_355] : memref<9x24x128xf32, #tpu.memory_space<vmem>>, vector<1x24x128xf32>
    %430 = vector.shape_cast %429 : vector<1x24x128xf32> to vector<24x128xf32>
    %431 = vector.shape_cast %428 : vector<24x128xf32> to vector<1x24x128xf32>
    tpu.vector_store %arg6[%c7_353, %c0_354, %c0_355], %431 {strides = array<i32>} : memref<9x24x128xf32, #tpu.memory_space<vmem>>, vector<1x24x128xf32>,
    %c7_356 = arith.constant 7 : index
    %c0_357 = arith.constant 0 : index
    %c0_358 = arith.constant 0 : index
    %432 = vector.load %arg6[%c7_356, %c0_357, %c0_358] : memref<9x24x128xf32, #tpu.memory_space<vmem>>, vector<1x16x128xf32>
    %433 = vector.shape_cast %432 : vector<1x16x128xf32> to vector<16x128xf32>
    %c7_359 = arith.constant 7 : index
    %c0_360 = arith.constant 0 : index
    %c0_361 = arith.constant 0 : index
    %434 = vector.load %arg3[%c7_359, %c0_360, %c0_361] : memref<81x16x128xf32, #tpu.memory_space<vmem>>, vector<1x16x128xf32>
    %435 = vector.shape_cast %434 : vector<1x16x128xf32> to vector<16x128xf32>
    %436 = arith.mulf %433, %435 : vector<16x128xf32>
    %437 = arith.addf %407, %436 : vector<16x128xf32>
    %c7_362 = arith.constant 7 : index
    %c1_363 = arith.constant 1 : index
    %c0_364 = arith.constant 0 : index
    %438 = vector.load %arg6[%c7_362, %c1_363, %c0_364] : memref<9x24x128xf32, #tpu.memory_space<vmem>>, vector<1x16x128xf32>
    %439 = vector.shape_cast %438 : vector<1x16x128xf32> to vector<16x128xf32>
    %c16_365 = arith.constant 16 : index
    %c0_366 = arith.constant 0 : index
    %c0_367 = arith.constant 0 : index
    %440 = vector.load %arg3[%c16_365, %c0_366, %c0_367] : memref<81x16x128xf32, #tpu.memory_space<vmem>>, vector<1x16x128xf32>
    %441 = vector.shape_cast %440 : vector<1x16x128xf32> to vector<16x128xf32>
    %442 = arith.mulf %439, %441 : vector<16x128xf32>
    %443 = arith.addf %413, %442 : vector<16x128xf32>
    %c7_368 = arith.constant 7 : index
    %c2_369 = arith.constant 2 : index
    %c0_370 = arith.constant 0 : index
    %444 = vector.load %arg6[%c7_368, %c2_369, %c0_370] : memref<9x24x128xf32, #tpu.memory_space<vmem>>, vector<1x16x128xf32>
    %445 = vector.shape_cast %444 : vector<1x16x128xf32> to vector<16x128xf32>
    %c25 = arith.constant 25 : index
    %c0_371 = arith.constant 0 : index
    %c0_372 = arith.constant 0 : index
    %446 = vector.load %arg3[%c25, %c0_371, %c0_372] : memref<81x16x128xf32, #tpu.memory_space<vmem>>, vector<1x16x128xf32>
    %447 = vector.shape_cast %446 : vector<1x16x128xf32> to vector<16x128xf32>
    %448 = arith.mulf %445, %447 : vector<16x128xf32>
    %449 = arith.addf %419, %448 : vector<16x128xf32>
    %c7_373 = arith.constant 7 : index
    %c3_374 = arith.constant 3 : index
    %c0_375 = arith.constant 0 : index
    %450 = vector.load %arg6[%c7_373, %c3_374, %c0_375] : memref<9x24x128xf32, #tpu.memory_space<vmem>>, vector<1x16x128xf32>
    %451 = vector.shape_cast %450 : vector<1x16x128xf32> to vector<16x128xf32>
    %c34 = arith.constant 34 : index
    %c0_376 = arith.constant 0 : index
    %c0_377 = arith.constant 0 : index
    %452 = vector.load %arg3[%c34, %c0_376, %c0_377] : memref<81x16x128xf32, #tpu.memory_space<vmem>>, vector<1x16x128xf32>
    %453 = vector.shape_cast %452 : vector<1x16x128xf32> to vector<16x128xf32>
    %454 = arith.mulf %451, %453 : vector<16x128xf32>
    %455 = arith.addf %425, %454 : vector<16x128xf32>
    %c7_378 = arith.constant 7 : index
    %c4_379 = arith.constant 4 : index
    %c0_380 = arith.constant 0 : index
    %456 = vector.load %arg6[%c7_378, %c4_379, %c0_380] : memref<9x24x128xf32, #tpu.memory_space<vmem>>, vector<1x16x128xf32>
    %457 = vector.shape_cast %456 : vector<1x16x128xf32> to vector<16x128xf32>
    %c43 = arith.constant 43 : index
    %c0_381 = arith.constant 0 : index
    %c0_382 = arith.constant 0 : index
    %458 = vector.load %arg3[%c43, %c0_381, %c0_382] : memref<81x16x128xf32, #tpu.memory_space<vmem>>, vector<1x16x128xf32>
    %459 = vector.shape_cast %458 : vector<1x16x128xf32> to vector<16x128xf32>
    %460 = arith.mulf %457, %459 : vector<16x128xf32>
    %461 = arith.addf %437, %460 : vector<16x128xf32>
    %c7_383 = arith.constant 7 : index
    %c5_384 = arith.constant 5 : index
    %c0_385 = arith.constant 0 : index
    %462 = vector.load %arg6[%c7_383, %c5_384, %c0_385] : memref<9x24x128xf32, #tpu.memory_space<vmem>>, vector<1x16x128xf32>
    %463 = vector.shape_cast %462 : vector<1x16x128xf32> to vector<16x128xf32>
    %c52 = arith.constant 52 : index
    %c0_386 = arith.constant 0 : index
    %c0_387 = arith.constant 0 : index
    %464 = vector.load %arg3[%c52, %c0_386, %c0_387] : memref<81x16x128xf32, #tpu.memory_space<vmem>>, vector<1x16x128xf32>
    %465 = vector.shape_cast %464 : vector<1x16x128xf32> to vector<16x128xf32>
    %466 = arith.mulf %463, %465 : vector<16x128xf32>
    %467 = arith.addf %443, %466 : vector<16x128xf32>
    %c7_388 = arith.constant 7 : index
    %c6_389 = arith.constant 6 : index
    %c0_390 = arith.constant 0 : index
    %468 = vector.load %arg6[%c7_388, %c6_389, %c0_390] : memref<9x24x128xf32, #tpu.memory_space<vmem>>, vector<1x16x128xf32>
    %469 = vector.shape_cast %468 : vector<1x16x128xf32> to vector<16x128xf32>
    %c61 = arith.constant 61 : index
    %c0_391 = arith.constant 0 : index
    %c0_392 = arith.constant 0 : index
    %470 = vector.load %arg3[%c61, %c0_391, %c0_392] : memref<81x16x128xf32, #tpu.memory_space<vmem>>, vector<1x16x128xf32>
    %471 = vector.shape_cast %470 : vector<1x16x128xf32> to vector<16x128xf32>
    %472 = arith.mulf %469, %471 : vector<16x128xf32>
    %473 = arith.addf %449, %472 : vector<16x128xf32>
    %c7_393 = arith.constant 7 : index
    %c7_394 = arith.constant 7 : index
    %c0_395 = arith.constant 0 : index
    %474 = vector.load %arg6[%c7_393, %c7_394, %c0_395] : memref<9x24x128xf32, #tpu.memory_space<vmem>>, vector<1x16x128xf32>
    %475 = vector.shape_cast %474 : vector<1x16x128xf32> to vector<16x128xf32>
    %c70 = arith.constant 70 : index
    %c0_396 = arith.constant 0 : index
    %c0_397 = arith.constant 0 : index
    %476 = vector.load %arg3[%c70, %c0_396, %c0_397] : memref<81x16x128xf32, #tpu.memory_space<vmem>>, vector<1x16x128xf32>
    %477 = vector.shape_cast %476 : vector<1x16x128xf32> to vector<16x128xf32>
    %478 = arith.mulf %475, %477 : vector<16x128xf32>
    %479 = arith.addf %455, %478 : vector<16x128xf32>
    %c7_398 = arith.constant 7 : index
    %c8_399 = arith.constant 8 : index
    %c0_400 = arith.constant 0 : index
    %480 = vector.load %arg6[%c7_398, %c8_399, %c0_400] : memref<9x24x128xf32, #tpu.memory_space<vmem>>, vector<1x16x128xf32>
    %481 = vector.shape_cast %480 : vector<1x16x128xf32> to vector<16x128xf32>
    %c79 = arith.constant 79 : index
    %c0_401 = arith.constant 0 : index
    %c0_402 = arith.constant 0 : index
    %482 = vector.load %arg3[%c79, %c0_401, %c0_402] : memref<81x16x128xf32, #tpu.memory_space<vmem>>, vector<1x16x128xf32>
    %483 = vector.shape_cast %482 : vector<1x16x128xf32> to vector<16x128xf32>
    %484 = arith.mulf %481, %483 : vector<16x128xf32>
    %485 = arith.addf %461, %484 : vector<16x128xf32>
    %c0_403 = arith.constant 0 : index
    %486 = arith.index_cast %1 : i32 to index
    %c64_404 = arith.constant 64 : index
    %487 = vector.load %arg2[%c0_403, %486, %c64_404] : memref<1x24x192xf32, #tpu.memory_space<vmem>>, vector<1x24x128xf32>
    %488 = vector.shape_cast %487 : vector<1x24x128xf32> to vector<24x128xf32>
    %c8_405 = arith.constant 8 : index
    %c0_406 = arith.constant 0 : index
    %c0_407 = arith.constant 0 : index
    %489 = vector.load %arg6[%c8_405, %c0_406, %c0_407] : memref<9x24x128xf32, #tpu.memory_space<vmem>>, vector<1x24x128xf32>
    %490 = vector.shape_cast %489 : vector<1x24x128xf32> to vector<24x128xf32>
    %491 = vector.shape_cast %488 : vector<24x128xf32> to vector<1x24x128xf32>
    tpu.vector_store %arg6[%c8_405, %c0_406, %c0_407], %491 {strides = array<i32>} : memref<9x24x128xf32, #tpu.memory_space<vmem>>, vector<1x24x128xf32>,
    %c8_408 = arith.constant 8 : index
    %c0_409 = arith.constant 0 : index
    %c0_410 = arith.constant 0 : index
    %492 = vector.load %arg6[%c8_408, %c0_409, %c0_410] : memref<9x24x128xf32, #tpu.memory_space<vmem>>, vector<1x16x128xf32>
    %493 = vector.shape_cast %492 : vector<1x16x128xf32> to vector<16x128xf32>
    %c8_411 = arith.constant 8 : index
    %c0_412 = arith.constant 0 : index
    %c0_413 = arith.constant 0 : index
    %494 = vector.load %arg3[%c8_411, %c0_412, %c0_413] : memref<81x16x128xf32, #tpu.memory_space<vmem>>, vector<1x16x128xf32>
    %495 = vector.shape_cast %494 : vector<1x16x128xf32> to vector<16x128xf32>
    %496 = arith.mulf %493, %495 : vector<16x128xf32>
    %497 = arith.addf %467, %496 : vector<16x128xf32>
    %c8_414 = arith.constant 8 : index
    %c1_415 = arith.constant 1 : index
    %c0_416 = arith.constant 0 : index
    %498 = vector.load %arg6[%c8_414, %c1_415, %c0_416] : memref<9x24x128xf32, #tpu.memory_space<vmem>>, vector<1x16x128xf32>
    %499 = vector.shape_cast %498 : vector<1x16x128xf32> to vector<16x128xf32>
    %c17 = arith.constant 17 : index
    %c0_417 = arith.constant 0 : index
    %c0_418 = arith.constant 0 : index
    %500 = vector.load %arg3[%c17, %c0_417, %c0_418] : memref<81x16x128xf32, #tpu.memory_space<vmem>>, vector<1x16x128xf32>
    %501 = vector.shape_cast %500 : vector<1x16x128xf32> to vector<16x128xf32>
    %502 = arith.mulf %499, %501 : vector<16x128xf32>
    %503 = arith.addf %473, %502 : vector<16x128xf32>
    %c8_419 = arith.constant 8 : index
    %c2_420 = arith.constant 2 : index
    %c0_421 = arith.constant 0 : index
    %504 = vector.load %arg6[%c8_419, %c2_420, %c0_421] : memref<9x24x128xf32, #tpu.memory_space<vmem>>, vector<1x16x128xf32>
    %505 = vector.shape_cast %504 : vector<1x16x128xf32> to vector<16x128xf32>
    %c26 = arith.constant 26 : index
    %c0_422 = arith.constant 0 : index
    %c0_423 = arith.constant 0 : index
    %506 = vector.load %arg3[%c26, %c0_422, %c0_423] : memref<81x16x128xf32, #tpu.memory_space<vmem>>, vector<1x16x128xf32>
    %507 = vector.shape_cast %506 : vector<1x16x128xf32> to vector<16x128xf32>
    %508 = arith.mulf %505, %507 : vector<16x128xf32>
    %509 = arith.addf %479, %508 : vector<16x128xf32>
    %c8_424 = arith.constant 8 : index
    %c3_425 = arith.constant 3 : index
    %c0_426 = arith.constant 0 : index
    %510 = vector.load %arg6[%c8_424, %c3_425, %c0_426] : memref<9x24x128xf32, #tpu.memory_space<vmem>>, vector<1x16x128xf32>
    %511 = vector.shape_cast %510 : vector<1x16x128xf32> to vector<16x128xf32>
    %c35 = arith.constant 35 : index
    %c0_427 = arith.constant 0 : index
    %c0_428 = arith.constant 0 : index
    %512 = vector.load %arg3[%c35, %c0_427, %c0_428] : memref<81x16x128xf32, #tpu.memory_space<vmem>>, vector<1x16x128xf32>
    %513 = vector.shape_cast %512 : vector<1x16x128xf32> to vector<16x128xf32>
    %514 = arith.mulf %511, %513 : vector<16x128xf32>
    %515 = arith.addf %485, %514 : vector<16x128xf32>
    %c8_429 = arith.constant 8 : index
    %c4_430 = arith.constant 4 : index
    %c0_431 = arith.constant 0 : index
    %516 = vector.load %arg6[%c8_429, %c4_430, %c0_431] : memref<9x24x128xf32, #tpu.memory_space<vmem>>, vector<1x16x128xf32>
    %517 = vector.shape_cast %516 : vector<1x16x128xf32> to vector<16x128xf32>
    %c44 = arith.constant 44 : index
    %c0_432 = arith.constant 0 : index
    %c0_433 = arith.constant 0 : index
    %518 = vector.load %arg3[%c44, %c0_432, %c0_433] : memref<81x16x128xf32, #tpu.memory_space<vmem>>, vector<1x16x128xf32>
    %519 = vector.shape_cast %518 : vector<1x16x128xf32> to vector<16x128xf32>
    %520 = arith.mulf %517, %519 : vector<16x128xf32>
    %521 = arith.addf %497, %520 : vector<16x128xf32>
    %c8_434 = arith.constant 8 : index
    %c5_435 = arith.constant 5 : index
    %c0_436 = arith.constant 0 : index
    %522 = vector.load %arg6[%c8_434, %c5_435, %c0_436] : memref<9x24x128xf32, #tpu.memory_space<vmem>>, vector<1x16x128xf32>
    %523 = vector.shape_cast %522 : vector<1x16x128xf32> to vector<16x128xf32>
    %c53 = arith.constant 53 : index
    %c0_437 = arith.constant 0 : index
    %c0_438 = arith.constant 0 : index
    %524 = vector.load %arg3[%c53, %c0_437, %c0_438] : memref<81x16x128xf32, #tpu.memory_space<vmem>>, vector<1x16x128xf32>
    %525 = vector.shape_cast %524 : vector<1x16x128xf32> to vector<16x128xf32>
    %526 = arith.mulf %523, %525 : vector<16x128xf32>
    %527 = arith.addf %503, %526 : vector<16x128xf32>
    %c8_439 = arith.constant 8 : index
    %c6_440 = arith.constant 6 : index
    %c0_441 = arith.constant 0 : index
    %528 = vector.load %arg6[%c8_439, %c6_440, %c0_441] : memref<9x24x128xf32, #tpu.memory_space<vmem>>, vector<1x16x128xf32>
    %529 = vector.shape_cast %528 : vector<1x16x128xf32> to vector<16x128xf32>
    %c62 = arith.constant 62 : index
    %c0_442 = arith.constant 0 : index
    %c0_443 = arith.constant 0 : index
    %530 = vector.load %arg3[%c62, %c0_442, %c0_443] : memref<81x16x128xf32, #tpu.memory_space<vmem>>, vector<1x16x128xf32>
    %531 = vector.shape_cast %530 : vector<1x16x128xf32> to vector<16x128xf32>
    %532 = arith.mulf %529, %531 : vector<16x128xf32>
    %533 = arith.addf %509, %532 : vector<16x128xf32>
    %c8_444 = arith.constant 8 : index
    %c7_445 = arith.constant 7 : index
    %c0_446 = arith.constant 0 : index
    %534 = vector.load %arg6[%c8_444, %c7_445, %c0_446] : memref<9x24x128xf32, #tpu.memory_space<vmem>>, vector<1x16x128xf32>
    %535 = vector.shape_cast %534 : vector<1x16x128xf32> to vector<16x128xf32>
    %c71 = arith.constant 71 : index
    %c0_447 = arith.constant 0 : index
    %c0_448 = arith.constant 0 : index
    %536 = vector.load %arg3[%c71, %c0_447, %c0_448] : memref<81x16x128xf32, #tpu.memory_space<vmem>>, vector<1x16x128xf32>
    %537 = vector.shape_cast %536 : vector<1x16x128xf32> to vector<16x128xf32>
    %538 = arith.mulf %535, %537 : vector<16x128xf32>
    %539 = arith.addf %515, %538 : vector<16x128xf32>
    %c8_449 = arith.constant 8 : index
    %c8_450 = arith.constant 8 : index
    %c0_451 = arith.constant 0 : index
    %540 = vector.load %arg6[%c8_449, %c8_450, %c0_451] : memref<9x24x128xf32, #tpu.memory_space<vmem>>, vector<1x16x128xf32>
    %541 = vector.shape_cast %540 : vector<1x16x128xf32> to vector<16x128xf32>
    %c80 = arith.constant 80 : index
    %c0_452 = arith.constant 0 : index
    %c0_453 = arith.constant 0 : index
    %542 = vector.load %arg3[%c80, %c0_452, %c0_453] : memref<81x16x128xf32, #tpu.memory_space<vmem>>, vector<1x16x128xf32>
    %543 = vector.shape_cast %542 : vector<1x16x128xf32> to vector<16x128xf32>
    %544 = arith.mulf %541, %543 : vector<16x128xf32>
    %545 = arith.addf %521, %544 : vector<16x128xf32>
    %546 = arith.addf %545, %527 : vector<16x128xf32>
    %547 = arith.addf %533, %539 : vector<16x128xf32>
    %548 = arith.addf %546, %547 : vector<16x128xf32>
    %cst_454 = arith.constant 0.000000e+00 : f32
    %549 = vector.broadcast %cst_454 : f32 to vector<16x128xf32>
    %550 = arith.maximumf %548, %549 : vector<16x128xf32>
    %c0_455 = arith.constant 0 : index
    %c0_456 = arith.constant 0 : index
    %c0_457 = arith.constant 0 : index
    %551 = vector.load %arg5[%c0_455, %c0_456, %c0_457] : memref<1x16x128xf32, #tpu.memory_space<vmem>>, vector<1x16x128xf32>
    %552 = vector.shape_cast %551 : vector<1x16x128xf32> to vector<16x128xf32>
    %553 = vector.shape_cast %550 : vector<16x128xf32> to vector<1x16x128xf32>
    tpu.vector_store %arg5[%c0_455, %c0_456, %c0_457], %553 {strides = array<i32>} : memref<1x16x128xf32, #tpu.memory_space<vmem>>, vector<1x16x128xf32>,
    return
  }
  func.func @transform_0(%arg0: i32, %arg1: i32) -> (i32, i32, i32) {
    %c0_i32 = arith.constant 0 : i32
    %c0_i32_0 = arith.constant 0 : i32
    %c0_i32_1 = arith.constant 0 : i32
    return %arg0, %c0_i32, %c0_i32_0 : i32, i32, i32
  }
  func.func @transform_1(%arg0: i32, %arg1: i32) -> (i32, i32, i32) {
    %c0_i32 = arith.constant 0 : i32
    %c0_i32_0 = arith.constant 0 : i32
    %c0_i32_1 = arith.constant 0 : i32
    %c0_i32_2 = arith.constant 0 : i32
    return %c0_i32, %c0_i32_0, %c0_i32_1 : i32, i32, i32
  }
  func.func @transform_2(%arg0: i32, %arg1: i32) -> (i32, i32) {
    %c0_i32 = arith.constant 0 : i32
    %c0_i32_0 = arith.constant 0 : i32
    %c0_i32_1 = arith.constant 0 : i32
    return %c0_i32, %c0_i32_0 : i32, i32
  }
  func.func @transform_3(%arg0: i32, %arg1: i32) -> (i32, i32, i32) {
    %c0_i32 = arith.constant 0 : i32
    %c0_i32_0 = arith.constant 0 : i32
    return %arg0, %arg1, %c0_i32 : i32, i32, i32
  }
}

</mosaic_0001>

<bundles_post_ra>
// kernel: tpu_custom_call.1
= control target key start
LH: loop header
LB: loop body
LE: loop exit
PB: predicated region body
PF: predicated region fallthrough
CT: control target
= control target key end

     0   :  { %8 = vsyncpa [#allocation4], 0  ;;  %s1431_s0 = inlined_call_operand.hbm [shape: f32[1,24,192], index: 0, kind: input, shape index: {}]   ;;  %s1432_s1 = inlined_call_operand.hbm [shape: f32[81,16,128], index: 1, kind: input, shape index: {}]   ;;  %s1433_s2 = inlined_call_operand.hbm [shape: f32[16,128], index: 2, kind: input, shape index: {}]   ;;  %s1434_s3 = inlined_call_operand.hbm [shape: f32[1,16,128], index: 3, kind: output, shape index: {}]  }
   0x1   :  { %9 = vsyncpa [#allocation7], 0 }
   0x2   :  { %10 = vsyncpa [#allocation5], 0  ;;  %s1201_s12 = smov [#allocation6]  }
   0x3   :  { %s28_s13 = sshll.u32 %s1201_s12, 4  ;;  %s29_s13 = int_to_ptr.vmem [resolvable:$true] %s28_s13 }
   0x4   :  { %s1123_s14 = scalar_lea.vmem %s29_s13, 20736  ;;  %p1128_p1 = scmp.lt.s32.totalorder %s29_s13, %s29_s13 }
   0x5   :  { %p1124_p0 = scmp.ne.s32.totalorder %s29_s13, %s1123_s14  ;;  %p1129_p2 = scmp.lt.s32.totalorder %s1123_s14, %s1123_s14 }
   0x7   :  { %p1130_p3 = por %p1129_p2, %p1128_p1 }
   0x9   :  { %p1131_p4 = pnand %p1130_p3, %p1124_p0 }
   0xb   :  { %1134 = shalt.err (!%p1131_p4)
}
   0xc   :  { %s1202_s15 = smov 128   ;;  %s1203_s16 = smov 8  }
   0xd   :  { %34 = dma.hbm_to_vmem [thread:$0]  %s1432_s1, 20736, %s29_s13, [#allocation7], %s1202_s15, %s1202_s15, %s1203_s16  }
   0xe   :  { %s1204_s19 = smov [#allocation3]  }
   0xf   :  { %s16_s20 = sshll.u32 %s1204_s19, 4  ;;  %s17_s20 = int_to_ptr.vmem [resolvable:$true] %s16_s20 }
  0x10   :  { %s1143_s21 = scalar_lea.vmem %s17_s20, 768  ;;  %p1148_p6 = scmp.lt.s32.totalorder %s17_s20, %s17_s20 }
  0x11   :  { %p1144_p5 = scmp.ne.s32.totalorder %s17_s20, %s1143_s21  ;;  %p1149_p7 = scmp.lt.s32.totalorder %s1143_s21, %s1143_s21 }
  0x13   :  { %p1150_p8 = por %p1149_p7, %p1148_p6 }
  0x15   :  { %p1151_p9 = pnand %p1150_p8, %p1144_p5 }
  0x17   :  { %1154 = shalt.err (!%p1151_p9)
}
  0x18   :  { %s1205_s22 = smov 256   ;;  %s1206_s23 = smov 16  }
  0x19   :  { %22 = dma.hbm_to_vmem [thread:$0]  %s1431_s0, 768, %s17_s20, [#allocation4], %s1205_s22, %s1205_s22, %s1206_s23  }
  0x1a   :  { %s1207_s26 = smov [#allocation8]  }
  0x1b   :  { %s40_s27 = sshll.u32 %s1207_s26, 4  ;;  %s41_s27 = int_to_ptr.vmem [resolvable:$true] %s40_s27 }
  0x1c   :  { %s1163_s1 = scalar_lea.vmem %s41_s27, 256  ;;  %p1168_p11 = scmp.lt.s32.totalorder %s41_s27, %s41_s27 }
  0x1d   :  { %p1164_p10 = scmp.ne.s32.totalorder %s41_s27, %s1163_s1  ;;  %p1169_p12 = scmp.lt.s32.totalorder %s1163_s1, %s1163_s1 }
  0x1f   :  { %p1170_p13 = por %p1169_p12, %p1168_p11 }
  0x21   :  { %p1171_p0 = pnand %p1170_p13, %p1164_p10 }
  0x23   :  { %1174 = shalt.err (!%p1171_p0)
}
  0x24   :  { %46 = dma.hbm_to_vmem [thread:$0]  %s1433_s2, 256, %s41_s27, [#allocation7], %s1202_s15, %s1202_s15, %s1203_s16  }
  0x25   :  { %1195 = dma.done.wait [#allocation4], 768  }
  0x26   :  { %1196 = vsyncadd [#allocation4], 4294966528 }
  0x27   :  { %1197 = dma.done.wait [#allocation7], 20992  }
  0x28   :  { %1198 = vsyncadd [#allocation7], 4294946304  ;;  %v1252_v0 = vld [vmem:[#allocation3 + $0x10] sm:$0xff]  ;;  %v1254_v1 = vld [vmem:[#allocation3] sm:$0xff]  ;;  %s1208_s0 = smov 120   ;;  %s1209_s2 = smov 112  }
  0x29   :  { %165 = vrot.lane.b32.xlu1 %v1252_v0, %s1208_s0  ;;  %161 = vrot.lane.b32.xlu0 %v1254_v1, %s1208_s0  ;;  %v1258_v2 = vld [vmem:[#allocation3 + $0x20] sm:$0xff]  ;;  %68 = vst [vmem:[#allocation2 + $0x8] sm:$0xff] %v1252_v0  ;;  %67 = vst [vmem:[#allocation2] sm:$0xff] %v1254_v1  ;;  %v152_v3 = vld [vmem:[#allocation3 + $0x18] sm:$0xff]  ;;  %s1210_s30 = smov 104   ;;  %s1211_s4 = smov 96  }
  0x2a   :  { %v150_v4 = vld [vmem:[#allocation3 + $0x8] sm:$0xff]  ;;  %69 = vst [vmem:[#allocation2 + $0x10] sm:$0xff] %v1258_v2  ;;  %s1212_s5 = smov 88   ;;  %s1213_s6 = smov 80   ;;  %vm173_vm0 = vcmask 982016   ;;  %vm288_vm1 = vcmask 916480  }
  0x2b   :  { %v154_v5 = vld [vmem:[#allocation3 + $0x28] sm:$0xff]  ;;  %s1214_s7 = smov 72   ;;  %s1215_s8 = smov 64   ;;  %v72_v27 = vld [vmem:[#allocation6] sm:$0xff]  ;;  %v57_v31 = vld [vmem:[#allocation8] sm:$0xff]  ;;  %vm403_vm2 = vcmask 850944  }
  0x2c   :  { %v82_v12 = vld [vmem:[#allocation6 + $0x98] sm:$0xff]  ;;  %v73_v33 = vld [vmem:[#allocation6 + $0x8] sm:$0xff]  ;;  %v74_v34 = vmul.f32 %v1254_v1, %v72_v27  ;;  %v81_v35 = vld [vmem:[#allocation6 + $0x90] sm:$0xff]  ;;  %vm518_vm3 = vcmask 785408   ;;  %vm633_vm4 = vcmask 719872   ;;  %vm748_vm5 = vcmask 654336  }
  0x2d   :  { %167 = vrot.lane.b32.xlu1 %v152_v3, %s1208_s0  ;;  %163 = vrot.lane.b32.xlu0 %v150_v4, %s1208_s0  ;;  %v118_v15 = vld [vmem:[#allocation6 + $0x2d8] sm:$0xff]  ;;  %v90_v40 = vld [vmem:[#allocation6 + $0x120] sm:$0xff]  ;;  %v117_v46 = vld [vmem:[#allocation6 + $0x2d0] sm:$0xff]  ;;  %v75_v62 = vmul.f32 %v1252_v0, %v73_v33  ;;  %vm863_vm6 = vcmask 588800   ;;  %vm978_vm7 = vcmask 523264   ;;  %s1216_s9 = smov [#allocation9]  }
  0x2e   :  { %v188_v21 = vld [vmem:[#allocation6 + $0x18] sm:$0xff]  ;;  %v108_v42 = vld [vmem:[#allocation6 + $0x240] sm:$0xff]  ;;  %v99_v50 = vld [vmem:[#allocation6 + $0x1b0] sm:$0xff]  ;;  %v76_v55 = vadd.f32 %v74_v34, %v57_v31  ;;  %s1084_s10 = sshll.u32 %s1216_s9, 4  ;;  %s1085_s10 = int_to_ptr.vmem [resolvable:$true] %s1084_s10 }
  0x2f   :  { %v224_v28 = vld [vmem:[#allocation6 + $0x258] sm:$0xff]  ;;  %v126_v52 = vld [vmem:[#allocation6 + $0x360] sm:$0xff]  ;;  %v135_v58 = vld [vmem:[#allocation6 + $0x3f0] sm:$0xff]  ;;  %s1175_s11 = scalar_lea.vmem %s1085_s10, 256  ;;  %p1180_p2 = scmp.lt.s32.totalorder %s1085_s10, %s1085_s10 }
  0x30   :  { %v259_v36 = vld [vmem:[#allocation6 + $0x498] sm:$0xff]  ;;  %v143_v59 = vld [vmem:[#allocation6 + $0x480] sm:$0xff]  ;;  %p1176_p1 = scmp.ne.s32.totalorder %s1085_s10, %s1175_s11  ;;  %p1181_p3 = scmp.lt.s32.totalorder %s1175_s11, %s1175_s11 }
  0x31   :  { %171 = vrot.lane.b32.xlu1 %v154_v5, %s1208_s0  ;;  %169 = vrot.lane.b32.xlu0 %v1258_v2, %s1208_s0  ;;  %v79_v13 = vld [vmem:[#allocation2 + $0x9] sm:$0xff]  ;;  %v78_v39 = vld [vmem:[#allocation2 + $0x1] sm:$0xff] }
  0x32   :  { %v115_v14 = vld [vmem:[#allocation2 + $0xd] sm:$0xff]  ;;  %v84_v19 = vmul.f32 %v82_v12, %v79_v13  ;;  %v105_v41 = vld [vmem:[#allocation2 + $0x4] sm:$0xff]  ;;  %v83_v63 = vmul.f32 %v81_v35, %v78_v39  ;;  %p1182_p4 = por %p1181_p3, %p1180_p2 }
  0x33   :  { %v120_v20 = vmul.f32 %v118_v15, %v115_v14  ;;  %v87_v44 = vld [vmem:[#allocation2 + $0x2] sm:$0xff]  ;;  %v110_v56 = vmul.f32 %v108_v42, %v105_v41  ;;  %v97_v12 = vld [vmem:[#allocation2 + $0xb] sm:$0xff] }
  0x34   :  { %v114_v45 = vld [vmem:[#allocation2 + $0x5] sm:$0xff]  ;;  %v109_v14 = vld [vmem:[#allocation6 + $0x248] sm:$0xff]  ;;  %p1183_p5 = pnand %p1182_p4, %p1176_p1 }
  0x35   :  { %278 = vrot.lane.b32.xlu1 %v150_v4, %s1209_s2  ;;  %276 = vrot.lane.b32.xlu0 %v1254_v1, %s1209_s2  ;;  %v122_v25 = vadd.f32 %v120_v20, %v84_v19  ;;  %v96_v49 = vld [vmem:[#allocation2 + $0x3] sm:$0xff]  ;;  %v106_v13 = vld [vmem:[#allocation2 + $0xc] sm:$0xff] }
  0x36   :  { %v123_v51 = vld [vmem:[#allocation2 + $0x6] sm:$0xff]  ;;  %v127_v19 = vld [vmem:[#allocation6 + $0x368] sm:$0xff]  ;;  %v111_v34 = vmul.f32 %v109_v14, %v106_v13 }
  0x37   :  { %v132_v57 = vld [vmem:[#allocation2 + $0x7] sm:$0xff]  ;;  %v144_v41 = vld [vmem:[#allocation6 + $0x488] sm:$0xff] }
  0x38   :  { %v196_v61 = vld [vmem:[#allocation6 + $0xa0] sm:$0xff]  ;;  %v136_v27 = vld [vmem:[#allocation6 + $0x3f8] sm:$0xff] }
  0x39   :  { %282 = vrot.lane.b32.xlu1 %v152_v3, %s1209_s2  ;;  %280 = vrot.lane.b32.xlu0 %v1252_v0, %s1209_s2  ;;  %v214_v35 = vld [vmem:[#allocation6 + $0x1c0] sm:$0xff] }
  0x3d   :  { %286 = vrot.lane.b32.xlu1 %v154_v5, %s1209_s2  ;;  %284 = vrot.lane.b32.xlu0 %v1258_v2, %s1209_s2 }
  0x41   :  { %393 = vrot.lane.b32.xlu1 %v150_v4, %s1210_s30  ;;  %391 = vrot.lane.b32.xlu0 %v1254_v1, %s1210_s30 }
  0x45   :  { %397 = vrot.lane.b32.xlu1 %v152_v3, %s1210_s30  ;;  %395 = vrot.lane.b32.xlu0 %v1252_v0, %s1210_s30 }
  0x49   :  { %401 = vrot.lane.b32.xlu1 %v154_v5, %s1210_s30  ;;  %399 = vrot.lane.b32.xlu0 %v1258_v2, %s1210_s30 }
  0x4d   :  { %508 = vrot.lane.b32.xlu1 %v150_v4, %s1211_s4  ;;  %506 = vrot.lane.b32.xlu0 %v1254_v1, %s1211_s4 }
  0x51   :  { %512 = vrot.lane.b32.xlu1 %v152_v3, %s1211_s4  ;;  %510 = vrot.lane.b32.xlu0 %v1252_v0, %s1211_s4 }
  0x55   :  { %516 = vrot.lane.b32.xlu1 %v154_v5, %s1211_s4  ;;  %514 = vrot.lane.b32.xlu0 %v1258_v2, %s1211_s4 }
  0x59   :  { %623 = vrot.lane.b32.xlu1 %v150_v4, %s1212_s5  ;;  %621 = vrot.lane.b32.xlu0 %v1254_v1, %s1212_s5 }
  0x5d   :  { %627 = vrot.lane.b32.xlu1 %v152_v3, %s1212_s5  ;;  %625 = vrot.lane.b32.xlu0 %v1252_v0, %s1212_s5 }
  0x61   :  { %631 = vrot.lane.b32.xlu1 %v154_v5, %s1212_s5  ;;  %629 = vrot.lane.b32.xlu0 %v1258_v2, %s1212_s5 }
  0x65   :  { %738 = vrot.lane.b32.xlu1 %v150_v4, %s1213_s6  ;;  %736 = vrot.lane.b32.xlu0 %v1254_v1, %s1213_s6 }
  0x69   :  { %742 = vrot.lane.b32.xlu1 %v152_v3, %s1213_s6  ;;  %740 = vrot.lane.b32.xlu0 %v1252_v0, %s1213_s6 }
  0x6d   :  { %746 = vrot.lane.b32.xlu1 %v154_v5, %s1213_s6  ;;  %744 = vrot.lane.b32.xlu0 %v1258_v2, %s1213_s6 }
  0x71   :  { %853 = vrot.lane.b32.xlu1 %v150_v4, %s1214_s7  ;;  %851 = vrot.lane.b32.xlu0 %v1254_v1, %s1214_s7 }
  0x75   :  { %857 = vrot.lane.b32.xlu1 %v152_v3, %s1214_s7  ;;  %855 = vrot.lane.b32.xlu0 %v1252_v0, %s1214_s7 }
  0x79   :  { %861 = vrot.lane.b32.xlu1 %v154_v5, %s1214_s7  ;;  %859 = vrot.lane.b32.xlu0 %v1258_v2, %s1214_s7 }
  0x7d   :  { %968 = vrot.lane.b32.xlu1 %v150_v4, %s1215_s8  ;;  %966 = vrot.lane.b32.xlu0 %v1254_v1, %s1215_s8  ;;  %v119_v1 = vmul.f32 %v117_v46, %v114_v45  ;;  %v88_v4 = vld [vmem:[#allocation2 + $0xa] sm:$0xff] }
  0x81   :  { %972 = vrot.lane.b32.xlu1 %v152_v3, %s1215_s8  ;;  %970 = vrot.lane.b32.xlu0 %v1252_v0, %s1215_s8  ;;  %v58_v3 = vld [vmem:[#allocation8 + $0x8] sm:$0xff] }
  0x82   :  { %v77_v33 = vadd.f32 %v75_v62, %v58_v3 }
  0x85   :  { %976 = vrot.lane.b32.xlu1 %v154_v5, %s1215_s8  ;;  %974 = vrot.lane.b32.xlu0 %v1258_v2, %s1215_s8  ;;  %v91_v5 = vld [vmem:[#allocation6 + $0x128] sm:$0xff] }
  0x86   :  { %v93_v39 = vmul.f32 %v91_v5, %v88_v4 }
  0x9b   :  { %v166_v6 = vpop.permute.xlu1 %165  ;;  %v162_v7 = vpop.permute.xlu0 %161 }
  0x9f   :  { %v168_v8 = vpop.permute.xlu1 %167  ;;  %v164_v9 = vpop.permute.xlu0 %163 }
  0xa0   :  { %v1285_v10 = vsel %vm173_vm0, %v166_v6, %v168_v8  ;;  %v1287_v11 = vsel %vm173_vm0, %v162_v7, %v164_v9  ;;  %v187_v7 = vld [vmem:[#allocation6 + $0x10] sm:$0xff]  ;;  %v92_v8 = vmul.f32 %v90_v40, %v87_v44  ;;  %v128_v9 = vmul.f32 %v126_v52, %v123_v51  ;;  %v197_v52 = vld [vmem:[#allocation6 + $0xa8] sm:$0xff] }
  0xa1   :  { %182 = vst [vmem:[#allocation2 + $0x20] sm:$0xff] %v1285_v10  ;;  %181 = vst [vmem:[#allocation2 + $0x18] sm:$0xff] %v1287_v11  ;;  %v190_v26 = vmul.f32 %v188_v21, %v1285_v10  ;;  %v101_v21 = vmul.f32 %v99_v50, %v96_v49  ;;  %v223_v44 = vld [vmem:[#allocation6 + $0x250] sm:$0xff]  ;;  %v189_v45 = vmul.f32 %v187_v7, %v1287_v11  ;;  %v232_v49 = vld [vmem:[#allocation6 + $0x2e0] sm:$0xff] }
  0xa2   :  { %v146_v11 = vmul.f32 %v1258_v2, %v144_v41  ;;  %v233_v2 = vld [vmem:[#allocation6 + $0x2e8] sm:$0xff] }
  0xa3   :  { %v172_v16 = vpop.permute.xlu1 %171  ;;  %v170_v17 = vpop.permute.xlu0 %169  ;;  %v192_v38 = vadd.f32 %v190_v26, %v122_v25  ;;  %v100_v25 = vld [vmem:[#allocation6 + $0x1b8] sm:$0xff]  ;;  %v133_v26 = vld [vmem:[#allocation2 + $0xf] sm:$0xff] }
  0xa4   :  { %v176_v18 = vsel %vm173_vm0, %v170_v17, %v172_v16 }
  0xa5   :  { %183 = vst [vmem:[#allocation2 + $0x28] sm:$0xff] %v176_v18  ;;  %v261_v54 = vmul.f32 %v259_v36, %v176_v18  ;;  %v124_v18 = vld [vmem:[#allocation2 + $0xe] sm:$0xff]  ;;  %v130_v36 = vadd.f32 %v128_v9, %v92_v8  ;;  %v241_v8 = vld [vmem:[#allocation6 + $0x370] sm:$0xff] }
  0xa6   :  { %v129_v40 = vmul.f32 %v127_v19, %v124_v18  ;;  %v250_v9 = vld [vmem:[#allocation6 + $0x400] sm:$0xff] }
  0xa7   :  { %v279_v22 = vpop.permute.xlu1 %278  ;;  %v277_v23 = vpop.permute.xlu0 %276 }
  0xa8   :  { %v1292_v24 = vsel %vm288_vm1, %v277_v23, %v279_v22  ;;  %v193_v17 = vld [vmem:[#allocation2 + $0x19] sm:$0xff]  ;;  %v112_v22 = vadd.f32 %v110_v56, %v76_v55  ;;  %v137_v23 = vmul.f32 %v135_v58, %v132_v57  ;;  %v113_v58 = vadd.f32 %v111_v34, %v77_v33 }
  0xa9   :  { %296 = vst [vmem:[#allocation2 + $0x30] sm:$0xff] %v1292_v24  ;;  %v202_v31 = vld [vmem:[#allocation2 + $0x1a] sm:$0xff]  ;;  %v131_v3 = vadd.f32 %v129_v40, %v93_v39 }
  0xaa   :  { %v220_v46 = vld [vmem:[#allocation2 + $0x1c] sm:$0xff]  ;;  %v139_v50 = vadd.f32 %v137_v23, %v101_v21  ;;  %v302_v21 = vld [vmem:[#allocation6 + $0x20] sm:$0xff] }
  0xab   :  { %v283_v29 = vpop.permute.xlu1 %282  ;;  %v281_v30 = vpop.permute.xlu0 %280  ;;  %v229_v56 = vld [vmem:[#allocation2 + $0x1d] sm:$0xff] }
  0xac   :  { %v1297_v32 = vsel %vm288_vm1, %v281_v30, %v283_v29  ;;  %v221_v37 = vld [vmem:[#allocation2 + $0x24] sm:$0xff]  ;;  %v121_v29 = vadd.f32 %v119_v1, %v83_v63  ;;  %v145_v30 = vmul.f32 %v1252_v0, %v143_v59  ;;  %v225_v63 = vmul.f32 %v223_v44, %v220_v46  ;;  %v215_v1 = vld [vmem:[#allocation6 + $0x1c8] sm:$0xff]  ;;  %v329_v39 = vld [vmem:[#allocation6 + $0x1d0] sm:$0xff] }
  0xad   :  { %297 = vst [vmem:[#allocation2 + $0x38] sm:$0xff] %v1297_v32  ;;  %v226_v43 = vmul.f32 %v224_v28, %v221_v37  ;;  %v205_v28 = vld [vmem:[#allocation6 + $0x130] sm:$0xff]  ;;  %v198_v37 = vmul.f32 %v196_v61, %v193_v17  ;;  %v206_v57 = vld [vmem:[#allocation6 + $0x138] sm:$0xff]  ;;  %v234_v17 = vmul.f32 %v232_v49, %v229_v56 }
  0xae   :  { %v207_v51 = vmul.f32 %v205_v28, %v202_v31  ;;  %v203_v59 = vld [vmem:[#allocation2 + $0x22] sm:$0xff]  ;;  %v258_v61 = vld [vmem:[#allocation6 + $0x490] sm:$0xff]  ;;  %v148_v28 = vadd.f32 %v146_v11, %v113_v58 }
  0xaf   :  { %v287_v47 = vpop.permute.xlu1 %286  ;;  %v285_v48 = vpop.permute.xlu0 %284  ;;  %v228_v53 = vadd.f32 %v226_v43, %v192_v38  ;;  %v211_v38 = vld [vmem:[#allocation2 + $0x1b] sm:$0xff]  ;;  %v200_v62 = vadd.f32 %v198_v37, %v130_v36  ;;  %v212_v4 = vld [vmem:[#allocation2 + $0x23] sm:$0xff]  ;;  %v208_v19 = vmul.f32 %v206_v57, %v203_v59  ;;  %v260_v34 = vmul.f32 %v258_v61, %v1285_v10 }
  0xb0   :  { %v1302_v60 = vsel %vm288_vm1, %v285_v48, %v287_v47  ;;  %v102_v47 = vmul.f32 %v100_v25, %v97_v12  ;;  %v138_v48 = vmul.f32 %v136_v27, %v133_v26  ;;  %v216_v55 = vmul.f32 %v214_v35, %v211_v38  ;;  %v238_v13 = vld [vmem:[#allocation2 + $0x1e] sm:$0xff]  ;;  %v251_v27 = vld [vmem:[#allocation6 + $0x408] sm:$0xff]  ;;  %v248_v46 = vld [vmem:[#allocation2 + $0x27] sm:$0xff] }
  0xb1   :  { %v1305_v6 = vadd.f32 %v261_v54, %v228_v53  ;;  %298 = vst [vmem:[#allocation2 + $0x40] sm:$0xff] %v1302_v60  ;;  %v194_v53 = vld [vmem:[#allocation2 + $0x21] sm:$0xff]  ;;  %v147_v54 = vadd.f32 %v145_v30, %v112_v22  ;;  %v191_v12 = vadd.f32 %v189_v45, %v121_v29  ;;  %v311_v22 = vld [vmem:[#allocation6 + $0xb0] sm:$0xff]  ;;  %v217_v30 = vmul.f32 %v215_v1, %v212_v4 }
  0xb2   :  { %v140_v14 = vadd.f32 %v138_v48, %v102_v47  ;;  %v247_v18 = vld [vmem:[#allocation2 + $0x1f] sm:$0xff]  ;;  %v320_v29 = vld [vmem:[#allocation6 + $0x140] sm:$0xff]  ;;  %v236_v36 = vadd.f32 %v234_v17, %v200_v62  ;;  %v243_v37 = vmul.f32 %v241_v8, %v238_v13  ;;  %v304_v47 = vmul.f32 %v302_v21, %v1292_v24  ;;  %v303_v48 = vld [vmem:[#allocation6 + $0x28] sm:$0xff] }
  0xb3   :  { %v394_v15 = vpop.permute.xlu1 %393  ;;  %v392_v16 = vpop.permute.xlu0 %391  ;;  %v218_v25 = vadd.f32 %v216_v55, %v147_v54  ;;  %v242_v26 = vld [vmem:[#allocation6 + $0x378] sm:$0xff]  ;;  %v227_v35 = vadd.f32 %v225_v63, %v191_v12  ;;  %v219_v57 = vadd.f32 %v217_v30, %v148_v28  ;;  %v347_v11 = vld [vmem:[#allocation6 + $0x2f0] sm:$0xff]  ;;  %v356_v59 = vld [vmem:[#allocation6 + $0x380] sm:$0xff] }
  0xb4   :  { %v1309_v20 = vsel %vm403_vm2, %v392_v16, %v394_v15  ;;  %v199_v15 = vmul.f32 %v197_v52, %v194_v53  ;;  %v209_v16 = vadd.f32 %v207_v51, %v139_v50  ;;  %v308_v31 = vld [vmem:[#allocation2 + $0x31] sm:$0xff]  ;;  %v230_v38 = vld [vmem:[#allocation2 + $0x25] sm:$0xff]  ;;  %v210_v10 = vadd.f32 %v208_v19, %v140_v14 }
  0xb5   :  { %411 = vst [vmem:[#allocation2 + $0x48] sm:$0xff] %v1309_v20  ;;  %v317_v33 = vld [vmem:[#allocation2 + $0x32] sm:$0xff]  ;;  %v239_v45 = vld [vmem:[#allocation2 + $0x26] sm:$0xff]  ;;  %v313_v53 = vmul.f32 %v311_v22, %v308_v31  ;;  %v235_v58 = vmul.f32 %v233_v2, %v230_v38  ;;  %v306_v4 = vadd.f32 %v304_v47, %v236_v36 }
  0xb6   :  { %v326_v40 = vld [vmem:[#allocation2 + $0x33] sm:$0xff]  ;;  %v201_v44 = vadd.f32 %v199_v15, %v131_v3  ;;  %v245_v50 = vadd.f32 %v243_v37, %v209_v16  ;;  %v338_v51 = vld [vmem:[#allocation6 + $0x260] sm:$0xff]  ;;  %v322_v54 = vmul.f32 %v320_v29, %v317_v33  ;;  %v312_v61 = vld [vmem:[#allocation6 + $0xb8] sm:$0xff]  ;;  %v244_v1 = vmul.f32 %v242_v26, %v239_v45 }
  0xb7   :  { %v398_v42 = vpop.permute.xlu1 %397  ;;  %v396_v43 = vpop.permute.xlu0 %395  ;;  %v373_v52 = vld [vmem:[#allocation6 + $0x4a0] sm:$0xff]  ;;  %v335_v55 = vld [vmem:[#allocation2 + $0x34] sm:$0xff]  ;;  %v331_v24 = vmul.f32 %v329_v39, %v326_v40  ;;  %v330_v63 = vld [vmem:[#allocation6 + $0x1d8] sm:$0xff]  ;;  %v253_v3 = vmul.f32 %v251_v27, %v248_v46  ;;  %v305_v15 = vmul.f32 %v303_v48, %v1297_v32 }
  0xb8   :  { %v1315_v0 = vsel %vm403_vm2, %v396_v43, %v398_v42  ;;  %v252_v43 = vmul.f32 %v250_v9, %v247_v18  ;;  %v321_v62 = vld [vmem:[#allocation6 + $0x148] sm:$0xff]  ;;  %v309_v9 = vld [vmem:[#allocation2 + $0x39] sm:$0xff]  ;;  %v237_v14 = vadd.f32 %v235_v58, %v201_v44  ;;  %v340_v16 = vmul.f32 %v338_v51, %v335_v55  ;;  %v444_v51 = vld [vmem:[#allocation6 + $0x1e0] sm:$0xff] }
  0xb9   :  { %412 = vst [vmem:[#allocation2 + $0x50] sm:$0xff] %v1315_v0  ;;  %v374_v8 = vld [vmem:[#allocation6 + $0x4a8] sm:$0xff]  ;;  %v318_v18 = vld [vmem:[#allocation2 + $0x3a] sm:$0xff]  ;;  %v246_v21 = vadd.f32 %v244_v1, %v210_v10  ;;  %v375_v28 = vmul.f32 %v373_v52, %v1297_v32  ;;  %v255_v29 = vadd.f32 %v253_v3, %v219_v57  ;;  %v314_v33 = vmul.f32 %v312_v61, %v309_v9 }
  0xba   :  { %v254_v56 = vadd.f32 %v252_v43, %v218_v25  ;;  %v353_v17 = vld [vmem:[#allocation2 + $0x36] sm:$0xff]  ;;  %v315_v25 = vadd.f32 %v313_v53, %v245_v50  ;;  %v418_v37 = vld [vmem:[#allocation6 + $0x38] sm:$0xff]  ;;  %v426_v43 = vld [vmem:[#allocation6 + $0xc0] sm:$0xff]  ;;  %v307_v47 = vadd.f32 %v305_v15, %v237_v14  ;;  %v342_v48 = vadd.f32 %v340_v16, %v306_v4 }
  0xbb   :  { %v402_v5 = vpop.permute.xlu1 %401  ;;  %v400_v7 = vpop.permute.xlu0 %399  ;;  %v327_v2 = vld [vmem:[#allocation2 + $0x3b] sm:$0xff]  ;;  %v339_v30 = vld [vmem:[#allocation6 + $0x268] sm:$0xff]  ;;  %v358_v39 = vmul.f32 %v356_v59, %v353_v17  ;;  %v316_v61 = vadd.f32 %v314_v33, %v246_v21  ;;  %v1344_v1 = vmul.f32 %v418_v37, %v1315_v0 }
  0xbc   :  { %v1320_v23 = vsel %vm403_vm2, %v400_v7, %v402_v5  ;;  %v262_v5 = vadd.f32 %v260_v34, %v227_v35  ;;  %v344_v7 = vld [vmem:[#allocation2 + $0x35] sm:$0xff]  ;;  %v324_v26 = vadd.f32 %v322_v54, %v254_v56  ;;  %v1336_v35 = vmul.f32 %v374_v8, %v1302_v60  ;;  %v348_v40 = vld [vmem:[#allocation6 + $0x2f8] sm:$0xff]  ;;  %v462_v8 = vld [vmem:[#allocation6 + $0x300] sm:$0xff] }
  0xbd   :  { %413 = vst [vmem:[#allocation2 + $0x58] sm:$0xff] %v1320_v23  ;;  %v365_v22 = vld [vmem:[#allocation6 + $0x410] sm:$0xff]  ;;  %v349_v38 = vmul.f32 %v347_v11, %v344_v7  ;;  %v357_v10 = vld [vmem:[#allocation6 + $0x388] sm:$0xff] }
  0xbe   :  { %v362_v27 = vld [vmem:[#allocation2 + $0x37] sm:$0xff]  ;;  %v333_v31 = vadd.f32 %v331_v24, %v262_v5  ;;  %v360_v55 = vadd.f32 %v358_v39, %v324_v26  ;;  %v366_v24 = vld [vmem:[#allocation6 + $0x418] sm:$0xff] }
  0xbf   :  { %v509_v41 = vpop.permute.xlu1 %508  ;;  %v507_v42 = vpop.permute.xlu0 %506  ;;  %v336_v34 = vld [vmem:[#allocation2 + $0x3c] sm:$0xff]  ;;  %v367_v50 = vmul.f32 %v365_v22, %v362_v27  ;;  %v351_v54 = vadd.f32 %v349_v38, %v315_v25  ;;  %v445_v21 = vld [vmem:[#allocation6 + $0x1e8] sm:$0xff]  ;;  %v377_v25 = vadd.f32 %v375_v28, %v342_v48  ;;  %v480_v27 = vld [vmem:[#allocation6 + $0x420] sm:$0xff] }
  0xc0   :  { %v1326_v49 = vsel %vm518_vm3, %v507_v42, %v509_v41  ;;  %v417_v36 = vld [vmem:[#allocation6 + $0x30] sm:$0xff]  ;;  %v323_v41 = vmul.f32 %v321_v62, %v318_v18  ;;  %v332_v42 = vmul.f32 %v330_v63, %v327_v2  ;;  %v423_v32 = vld [vmem:[#allocation2 + $0x49] sm:$0xff]  ;;  %v341_v56 = vmul.f32 %v339_v30, %v336_v34  ;;  %v436_v2 = vld [vmem:[#allocation6 + $0x158] sm:$0xff] }
  0xc1   :  { %526 = vst [vmem:[#allocation2 + $0x60] sm:$0xff] %v1326_v49  ;;  %v435_v44 = vld [vmem:[#allocation6 + $0x150] sm:$0xff]  ;;  %v432_v52 = vld [vmem:[#allocation2 + $0x4a] sm:$0xff]  ;;  %v419_v58 = vmul.f32 %v417_v36, %v1309_v20  ;;  %v428_v3 = vmul.f32 %v426_v43, %v423_v32  ;;  %v369_v4 = vadd.f32 %v367_v50, %v333_v31  ;;  %v489_v36 = vld [vmem:[#allocation6 + $0x4b8] sm:$0xff] }
  0xc2   :  { %v441_v60 = vld [vmem:[#allocation2 + $0x4b] sm:$0xff]  ;;  %v345_v57 = vld [vmem:[#allocation2 + $0x3d] sm:$0xff]  ;;  %v325_v5 = vadd.f32 %v323_v41, %v255_v29  ;;  %v334_v7 = vadd.f32 %v332_v42, %v1305_v6  ;;  %v437_v9 = vmul.f32 %v435_v44, %v432_v52  ;;  %v343_v30 = vadd.f32 %v341_v56, %v307_v47 }
  0xc3   :  { %v513_v12 = vpop.permute.xlu1 %512  ;;  %v511_v13 = vpop.permute.xlu0 %510  ;;  %v453_v11 = vld [vmem:[#allocation6 + $0x270] sm:$0xff]  ;;  %v450_v59 = vld [vmem:[#allocation2 + $0x4c] sm:$0xff]  ;;  %v350_v17 = vmul.f32 %v348_v40, %v345_v57  ;;  %v421_v34 = vadd.f32 %v419_v58, %v351_v54  ;;  %v430_v42 = vadd.f32 %v428_v3, %v360_v55  ;;  %v454_v44 = vld [vmem:[#allocation6 + $0x278] sm:$0xff]  ;;  %v1356_v56 = vmul.f32 %v489_v36, %v1320_v23 }
  0xc4   :  { %v1331_v19 = vsel %vm518_vm3, %v511_v13, %v513_v12  ;;  %v354_v62 = vld [vmem:[#allocation2 + $0x3e] sm:$0xff]  ;;  %v446_v12 = vmul.f32 %v444_v51, %v441_v60  ;;  %v427_v20 = vld [vmem:[#allocation6 + $0xc8] sm:$0xff]  ;;  %v455_v18 = vmul.f32 %v453_v11, %v450_v59  ;;  %v439_v50 = vadd.f32 %v437_v9, %v369_v4  ;;  %v532_v55 = vld [vmem:[#allocation6 + $0x40] sm:$0xff] }
  0xc5   :  { %527 = vst [vmem:[#allocation2 + $0x68] sm:$0xff] %v1331_v19  ;;  %v363_v63 = vld [vmem:[#allocation2 + $0x3f] sm:$0xff]  ;;  %v424_v13 = vld [vmem:[#allocation2 + $0x51] sm:$0xff]  ;;  %v359_v6 = vmul.f32 %v357_v10, %v354_v62  ;;  %v352_v37 = vadd.f32 %v350_v17, %v316_v61  ;;  %v550_v62 = vld [vmem:[#allocation6 + $0x160] sm:$0xff]  ;;  %v378_v4 = vadd.f32 %v1336_v35, %v343_v30 }
  0xc6   :  { %v488_v16 = vld [vmem:[#allocation6 + $0x4b0] sm:$0xff]  ;;  %v368_v29 = vmul.f32 %v366_v24, %v363_v63  ;;  %v459_v31 = vld [vmem:[#allocation2 + $0x4d] sm:$0xff]  ;;  %v429_v39 = vmul.f32 %v427_v20, %v424_v13  ;;  %v448_v10 = vadd.f32 %v446_v12, %v377_v25  ;;  %v457_v60 = vadd.f32 %v455_v18, %v421_v34  ;;  %v472_v54 = vld [vmem:[#allocation6 + $0x398] sm:$0xff] }
  0xc7   :  { %v517_v45 = vpop.permute.xlu1 %516  ;;  %v515_v46 = vpop.permute.xlu0 %514  ;;  %v471_v26 = vld [vmem:[#allocation6 + $0x390] sm:$0xff]  ;;  %v468_v33 = vld [vmem:[#allocation2 + $0x4e] sm:$0xff]  ;;  %v490_v28 = vmul.f32 %v488_v16, %v1315_v0  ;;  %v361_v43 = vadd.f32 %v359_v6, %v325_v5  ;;  %v464_v51 = vmul.f32 %v462_v8, %v459_v31  ;;  %v534_v18 = vmul.f32 %v532_v55, %v1326_v49 }
  0xc8   :  { %v1339_v53 = vsel %vm518_vm3, %v515_v46, %v517_v45  ;;  %v477_v38 = vld [vmem:[#allocation2 + $0x4f] sm:$0xff]  ;;  %v370_v48 = vadd.f32 %v368_v29, %v334_v7  ;;  %v473_v59 = vmul.f32 %v471_v26, %v468_v33  ;;  %v541_v61 = vld [vmem:[#allocation6 + $0xd0] sm:$0xff] }
  0xc9   :  { %528 = vst [vmem:[#allocation2 + $0x70] sm:$0xff] %v1339_v53  ;;  %v433_v40 = vld [vmem:[#allocation2 + $0x52] sm:$0xff]  ;;  %v482_v24 = vmul.f32 %v480_v27, %v477_v38  ;;  %v431_v5 = vadd.f32 %v429_v39, %v361_v43  ;;  %v466_v7 = vadd.f32 %v464_v51, %v430_v42  ;;  %v568_v12 = vld [vmem:[#allocation6 + $0x280] sm:$0xff]  ;;  %v492_v27 = vadd.f32 %v490_v28, %v457_v60  ;;  %v560_v28 = vld [vmem:[#allocation6 + $0x1f8] sm:$0xff] }
  0xca   :  { %v442_v41 = vld [vmem:[#allocation2 + $0x53] sm:$0xff]  ;;  %v438_v57 = vmul.f32 %v436_v2, %v433_v40  ;;  %v475_v16 = vadd.f32 %v473_v59, %v439_v50  ;;  %v542_v2 = vld [vmem:[#allocation6 + $0xd8] sm:$0xff]  ;;  %v603_v25 = vld [vmem:[#allocation6 + $0x4c0] sm:$0xff] }
  0xcb   :  { %v624_v14 = vpop.permute.xlu1 %623  ;;  %v622_v15 = vpop.permute.xlu0 %621  ;;  %v463_v32 = vld [vmem:[#allocation6 + $0x308] sm:$0xff]  ;;  %v447_v58 = vmul.f32 %v445_v21, %v442_v41  ;;  %v559_v9 = vld [vmem:[#allocation6 + $0x1f0] sm:$0xff]  ;;  %v484_v17 = vadd.f32 %v482_v24, %v448_v10  ;;  %v536_v41 = vadd.f32 %v534_v18, %v466_v7  ;;  %v586_v60 = vld [vmem:[#allocation6 + $0x3a0] sm:$0xff] }
  0xcc   :  { %v1348_v22 = vsel %vm633_vm4, %v622_v15, %v624_v14  ;;  %v451_v45 = vld [vmem:[#allocation2 + $0x54] sm:$0xff]  ;;  %v538_v23 = vld [vmem:[#allocation2 + $0x61] sm:$0xff]  ;;  %v422_v15 = vadd.f32 %v1344_v1, %v352_v37  ;;  %v440_v1 = vadd.f32 %v438_v57, %v370_v48 }
  0xcd   :  { %641 = vst [vmem:[#allocation2 + $0x78] sm:$0xff] %v1348_v22  ;;  %v533_v0 = vld [vmem:[#allocation6 + $0x48] sm:$0xff]  ;;  %v456_v63 = vmul.f32 %v454_v44, %v451_v45  ;;  %v547_v21 = vld [vmem:[#allocation2 + $0x62] sm:$0xff]  ;;  %v449_v33 = vadd.f32 %v447_v58, %v378_v4  ;;  %v543_v36 = vmul.f32 %v541_v61, %v538_v23  ;;  %v577_v44 = vld [vmem:[#allocation6 + $0x310] sm:$0xff] }
  0xce   :  { %v460_v11 = vld [vmem:[#allocation2 + $0x55] sm:$0xff]  ;;  %v535_v30 = vmul.f32 %v533_v0, %v1331_v19  ;;  %v556_v29 = vld [vmem:[#allocation2 + $0x63] sm:$0xff]  ;;  %v552_v42 = vmul.f32 %v550_v62, %v547_v21 }
  0xcf   :  { %v628_v46 = vpop.permute.xlu1 %627  ;;  %v626_v47 = vpop.permute.xlu0 %625  ;;  %v469_v3 = vld [vmem:[#allocation2 + $0x56] sm:$0xff]  ;;  %v465_v26 = vmul.f32 %v463_v32, %v460_v11  ;;  %v565_v31 = vld [vmem:[#allocation2 + $0x64] sm:$0xff]  ;;  %v458_v39 = vadd.f32 %v456_v63, %v422_v15  ;;  %v561_v50 = vmul.f32 %v559_v9, %v556_v29  ;;  %v605_v11 = vmul.f32 %v603_v25, %v1331_v19 }
  0xd0   :  { %v1353_v52 = vsel %vm633_vm4, %v626_v47, %v628_v46  ;;  %v481_v8 = vld [vmem:[#allocation6 + $0x428] sm:$0xff]  ;;  %v474_v34 = vmul.f32 %v472_v54, %v469_v3  ;;  %v570_v51 = vmul.f32 %v568_v12, %v565_v31  ;;  %v574_v0 = vld [vmem:[#allocation2 + $0x65] sm:$0xff]  ;;  %v595_v58 = vld [vmem:[#allocation6 + $0x430] sm:$0xff]  ;;  %v545_v63 = vadd.f32 %v543_v36, %v475_v16 }
  0xd1   :  { %642 = vst [vmem:[#allocation2 + $0x80] sm:$0xff] %v1353_v52  ;;  %v478_v20 = vld [vmem:[#allocation2 + $0x57] sm:$0xff]  ;;  %v539_v6 = vld [vmem:[#allocation2 + $0x69] sm:$0xff]  ;;  %v467_v40 = vadd.f32 %v465_v26, %v431_v5  ;;  %v578_v57 = vld [vmem:[#allocation6 + $0x318] sm:$0xff]  ;;  %v554_v9 = vadd.f32 %v552_v42, %v484_v17  ;;  %v563_v18 = vadd.f32 %v561_v50, %v492_v27  ;;  %v579_v21 = vmul.f32 %v577_v44, %v574_v0 }
  0xd2   :  { %v548_v49 = vld [vmem:[#allocation2 + $0x6a] sm:$0xff]  ;;  %v483_v46 = vmul.f32 %v481_v8, %v478_v20  ;;  %v544_v47 = vmul.f32 %v542_v2, %v539_v6  ;;  %v647_v24 = vld [vmem:[#allocation6 + $0x50] sm:$0xff]  ;;  %v476_v61 = vadd.f32 %v474_v34, %v440_v1  ;;  %v596_v7 = vld [vmem:[#allocation6 + $0x438] sm:$0xff]  ;;  %v493_v8 = vadd.f32 %v1356_v56, %v458_v39 }
  0xd3   :  { %v632_v13 = vpop.permute.xlu1 %631  ;;  %v630_v14 = vpop.permute.xlu0 %629  ;;  %v551_v37 = vld [vmem:[#allocation6 + $0x168] sm:$0xff]  ;;  %v583_v4 = vld [vmem:[#allocation2 + $0x66] sm:$0xff]  ;;  %v537_v23 = vadd.f32 %v535_v30, %v467_v40  ;;  %v572_v2 = vadd.f32 %v570_v51, %v536_v41  ;;  %v665_v26 = vld [vmem:[#allocation6 + $0x170] sm:$0xff]  ;;  %v649_v17 = vmul.f32 %v647_v24, %v1348_v22  ;;  %v581_v36 = vadd.f32 %v579_v21, %v545_v63 }
  0xd4   :  { %v1363_v35 = vsel %vm633_vm4, %v630_v14, %v632_v13  ;;  %v604_v38 = vld [vmem:[#allocation6 + $0x4c8] sm:$0xff]  ;;  %v553_v55 = vmul.f32 %v551_v37, %v548_v49  ;;  %v485_v62 = vadd.f32 %v483_v46, %v449_v33  ;;  %v592_v20 = vld [vmem:[#allocation2 + $0x67] sm:$0xff]  ;;  %v546_v15 = vadd.f32 %v544_v47, %v476_v61  ;;  %v683_v33 = vld [vmem:[#allocation6 + $0x290] sm:$0xff] }
  0xd5   :  { %643 = vst [vmem:[#allocation2 + $0x88] sm:$0xff] %v1363_v35  ;;  %v557_v43 = vld [vmem:[#allocation2 + $0x6b] sm:$0xff]  ;;  %v1372_v59 = vmul.f32 %v604_v38, %v1339_v53  ;;  %v588_v56 = vmul.f32 %v586_v60, %v583_v4  ;;  %v648_v30 = vld [vmem:[#allocation6 + $0x58] sm:$0xff]  ;;  %v597_v49 = vmul.f32 %v595_v58, %v592_v20  ;;  %v718_v22 = vld [vmem:[#allocation6 + $0x4d0] sm:$0xff] }
  0xd6   :  { %v566_v10 = vld [vmem:[#allocation2 + $0x6c] sm:$0xff]  ;;  %v562_v3 = vmul.f32 %v560_v28, %v557_v43  ;;  %v555_v29 = vadd.f32 %v553_v55, %v485_v62  ;;  %v666_v44 = vld [vmem:[#allocation6 + $0x178] sm:$0xff] }
  0xd7   :  { %v739_v32 = vpop.permute.xlu1 %738  ;;  %v737_v45 = vpop.permute.xlu0 %736  ;;  %v569_v48 = vld [vmem:[#allocation6 + $0x288] sm:$0xff]  ;;  %v656_v53 = vld [vmem:[#allocation6 + $0xe0] sm:$0xff]  ;;  %v590_v42 = vadd.f32 %v588_v56, %v554_v9  ;;  %v684_v63 = vld [vmem:[#allocation6 + $0x298] sm:$0xff]  ;;  %v720_v56 = vmul.f32 %v718_v22, %v1353_v52 }
  0xd8   :  { %v1368_v54 = vsel %vm748_vm5, %v737_v45, %v739_v32  ;;  %v587_v5 = vld [vmem:[#allocation6 + $0x3a8] sm:$0xff]  ;;  %v571_v12 = vmul.f32 %v569_v48, %v566_v10  ;;  %v653_v31 = vld [vmem:[#allocation2 + $0x79] sm:$0xff]  ;;  %v674_v1 = vld [vmem:[#allocation6 + $0x200] sm:$0xff]  ;;  %v564_v34 = vadd.f32 %v562_v3, %v493_v8  ;;  %v599_v10 = vadd.f32 %v597_v49, %v563_v18 }
  0xd9   :  { %756 = vst [vmem:[#allocation2 + $0x90] sm:$0xff] %v1368_v54  ;;  %v575_v19 = vld [vmem:[#allocation2 + $0x6d] sm:$0xff]  ;;  %v662_v38 = vld [vmem:[#allocation2 + $0x7a] sm:$0xff]  ;;  %v607_v48 = vadd.f32 %v605_v11, %v572_v2  ;;  %v658_v51 = vmul.f32 %v656_v53, %v653_v31 }
  0xda   :  { %v584_v25 = vld [vmem:[#allocation2 + $0x6e] sm:$0xff]  ;;  %v580_v27 = vmul.f32 %v578_v57, %v575_v19  ;;  %v671_v39 = vld [vmem:[#allocation2 + $0x7b] sm:$0xff]  ;;  %v573_v40 = vadd.f32 %v571_v12, %v537_v23  ;;  %v667_v24 = vmul.f32 %v665_v26, %v662_v38  ;;  %v651_v19 = vadd.f32 %v649_v17, %v581_v36 }
  0xdb   :  { %v743_v13 = vpop.permute.xlu1 %742  ;;  %v741_v14 = vpop.permute.xlu0 %740  ;;  %v593_v16 = vld [vmem:[#allocation2 + $0x6f] sm:$0xff]  ;;  %v589_v41 = vmul.f32 %v587_v5, %v584_v25  ;;  %v680_v32 = vld [vmem:[#allocation2 + $0x7c] sm:$0xff]  ;;  %v676_v61 = vmul.f32 %v674_v1, %v671_v39  ;;  %v650_v5 = vmul.f32 %v648_v30, %v1353_v52  ;;  %v660_v21 = vadd.f32 %v658_v51, %v590_v42 }
  0xdc   :  { %v1377_v6 = vsel %vm748_vm5, %v741_v14, %v743_v13  ;;  %v657_v37 = vld [vmem:[#allocation6 + $0xe8] sm:$0xff]  ;;  %v598_v43 = vmul.f32 %v596_v7, %v593_v16  ;;  %v654_v28 = vld [vmem:[#allocation2 + $0x81] sm:$0xff]  ;;  %v582_v50 = vadd.f32 %v580_v27, %v546_v15  ;;  %v685_v11 = vmul.f32 %v683_v33, %v680_v32  ;;  %v701_v8 = vld [vmem:[#allocation6 + $0x3b0] sm:$0xff] }
  0xdd   :  { %757 = vst [vmem:[#allocation2 + $0x98] sm:$0xff] %v1377_v6  ;;  %v719_v45 = vld [vmem:[#allocation6 + $0x4d8] sm:$0xff]  ;;  %v675_v0 = vld [vmem:[#allocation6 + $0x208] sm:$0xff]  ;;  %v591_v58 = vadd.f32 %v589_v41, %v555_v29  ;;  %v692_v3 = vld [vmem:[#allocation6 + $0x320] sm:$0xff]  ;;  %v659_v7 = vmul.f32 %v657_v37, %v654_v28  ;;  %v608_v12 = vadd.f32 %v1372_v59, %v573_v40  ;;  %v669_v17 = vadd.f32 %v667_v24, %v599_v10 }
  0xde   :  { %v663_v60 = vld [vmem:[#allocation2 + $0x82] sm:$0xff]  ;;  %v600_v4 = vadd.f32 %v598_v43, %v564_v34  ;;  %v693_v14 = vld [vmem:[#allocation6 + $0x328] sm:$0xff]  ;;  %v721_v30 = vmul.f32 %v719_v45, %v1363_v35  ;;  %v652_v59 = vadd.f32 %v650_v5, %v582_v50  ;;  %v678_v1 = vadd.f32 %v676_v61, %v607_v48  ;;  %v771_v27 = vld [vmem:[#allocation6 + $0xf0] sm:$0xff] }
  0xdf   :  { %v747_v46 = vpop.permute.xlu1 %746  ;;  %v745_v47 = vpop.permute.xlu0 %744  ;;  %v672_v55 = vld [vmem:[#allocation2 + $0x83] sm:$0xff]  ;;  %v668_v20 = vmul.f32 %v666_v44, %v663_v60  ;;  %v711_v29 = vld [vmem:[#allocation6 + $0x448] sm:$0xff]  ;;  %v661_v36 = vadd.f32 %v659_v7, %v591_v58  ;;  %v687_v49 = vadd.f32 %v685_v11, %v651_v19  ;;  %v789_v35 = vld [vmem:[#allocation6 + $0x210] sm:$0xff] }
  0xe0   :  { %v1382_v57 = vsel %vm748_vm5, %v745_v47, %v747_v46  ;;  %v681_v62 = vld [vmem:[#allocation2 + $0x84] sm:$0xff]  ;;  %v677_v53 = vmul.f32 %v675_v0, %v672_v55  ;;  %v763_v28 = vld [vmem:[#allocation6 + $0x68] sm:$0xff] }
  0xe1   :  { %758 = vst [vmem:[#allocation2 + $0xa0] sm:$0xff] %v1382_v57  ;;  %v710_v23 = vld [vmem:[#allocation6 + $0x440] sm:$0xff]  ;;  %v689_v13 = vld [vmem:[#allocation2 + $0x7d] sm:$0xff]  ;;  %v686_v25 = vmul.f32 %v684_v63, %v681_v62  ;;  %v670_v40 = vadd.f32 %v668_v20, %v600_v4  ;;  %v781_v60 = vld [vmem:[#allocation6 + $0x188] sm:$0xff]  ;;  %v722_v5 = vadd.f32 %v720_v56, %v687_v49 }
  0xe2   :  { %v762_v9 = vld [vmem:[#allocation6 + $0x60] sm:$0xff]  ;;  %v702_v15 = vld [vmem:[#allocation6 + $0x3b8] sm:$0xff]  ;;  %v694_v37 = vmul.f32 %v692_v3, %v689_v13  ;;  %v679_v41 = vadd.f32 %v677_v53, %v608_v12  ;;  %v825_v56 = vld [vmem:[#allocation6 + $0x450] sm:$0xff] }
  0xe3   :  { %v854_v18 = vpop.permute.xlu1 %853  ;;  %v852_v2 = vpop.permute.xlu0 %851  ;;  %v698_v16 = vld [vmem:[#allocation2 + $0x7e] sm:$0xff]  ;;  %v699_v34 = vld [vmem:[#allocation2 + $0x86] sm:$0xff]  ;;  %v764_v52 = vmul.f32 %v762_v9, %v1368_v54  ;;  %v688_v47 = vadd.f32 %v686_v25, %v652_v59  ;;  %v834_v9 = vld [vmem:[#allocation6 + $0x4e8] sm:$0xff]  ;;  %v765_v25 = vmul.f32 %v763_v28, %v1377_v6 }
  0xe4   :  { %v707_v26 = vld [vmem:[#allocation2 + $0x7f] sm:$0xff]  ;;  %v1390_v31 = vsel %vm863_vm6, %v852_v2, %v854_v18  ;;  %v708_v38 = vld [vmem:[#allocation2 + $0x87] sm:$0xff]  ;;  %v703_v42 = vmul.f32 %v701_v8, %v698_v16  ;;  %v768_v44 = vld [vmem:[#allocation2 + $0x91] sm:$0xff]  ;;  %v696_v10 = vadd.f32 %v694_v37, %v660_v21  ;;  %v704_v48 = vmul.f32 %v702_v15, %v699_v34 }
  0xe5   :  { %v690_v33 = vld [vmem:[#allocation2 + $0x85] sm:$0xff]  ;;  %871 = vst [vmem:[#allocation2 + $0xa8] sm:$0xff] %v1390_v31  ;;  %v712_v43 = vmul.f32 %v710_v23, %v707_v26  ;;  %v777_v32 = vld [vmem:[#allocation2 + $0x92] sm:$0xff]  ;;  %v713_v24 = vmul.f32 %v711_v29, %v708_v38  ;;  %v773_v7 = vmul.f32 %v771_v27, %v768_v44  ;;  %v723_v21 = vadd.f32 %v721_v30, %v688_v47 }
  0xe6   :  { %v780_v39 = vld [vmem:[#allocation6 + $0x180] sm:$0xff]  ;;  %v695_v50 = vmul.f32 %v693_v14, %v690_v33  ;;  %v772_v51 = vld [vmem:[#allocation6 + $0xf8] sm:$0xff]  ;;  %v786_v55 = vld [vmem:[#allocation2 + $0x93] sm:$0xff]  ;;  %v705_v58 = vadd.f32 %v703_v42, %v669_v17  ;;  %v706_v12 = vadd.f32 %v704_v48, %v670_v40 }
  0xe7   :  { %v798_v22 = vld [vmem:[#allocation6 + $0x2a0] sm:$0xff]  ;;  %v858_v45 = vpop.permute.xlu1 %857  ;;  %v856_v46 = vpop.permute.xlu0 %855  ;;  %v714_v61 = vadd.f32 %v712_v43, %v678_v1  ;;  %v795_v3 = vld [vmem:[#allocation2 + $0x94] sm:$0xff]  ;;  %v782_v11 = vmul.f32 %v780_v39, %v777_v32  ;;  %v790_v23 = vld [vmem:[#allocation6 + $0x218] sm:$0xff]  ;;  %v715_v19 = vadd.f32 %v713_v24, %v679_v41  ;;  %v791_v53 = vmul.f32 %v789_v35, %v786_v55 }
  0xe8   :  { %v833_v54 = vld [vmem:[#allocation6 + $0x4e0] sm:$0xff]  ;;  %v1395_v0 = vsel %vm863_vm6, %v856_v46, %v858_v45  ;;  %v769_v62 = vld [vmem:[#allocation2 + $0x99] sm:$0xff]  ;;  %v697_v4 = vadd.f32 %v695_v50, %v661_v36  ;;  %v799_v14 = vld [vmem:[#allocation6 + $0x2a8] sm:$0xff]  ;;  %v800_v26 = vmul.f32 %v798_v22, %v795_v3  ;;  %v766_v1 = vadd.f32 %v764_v52, %v696_v10 }
  0xe9   :  { %v778_v63 = vld [vmem:[#allocation2 + $0x9a] sm:$0xff]  ;;  %872 = vst [vmem:[#allocation2 + $0xb0] sm:$0xff] %v1395_v0  ;;  %v774_v20 = vmul.f32 %v772_v51, %v769_v62  ;;  %v816_v29 = vld [vmem:[#allocation6 + $0x3c0] sm:$0xff]  ;;  %v835_v49 = vmul.f32 %v833_v54, %v1377_v6  ;;  %v775_v30 = vadd.f32 %v773_v7, %v705_v58  ;;  %v784_v37 = vadd.f32 %v782_v11, %v714_v61  ;;  %v817_v35 = vld [vmem:[#allocation6 + $0x3c8] sm:$0xff] }
  0xea   :  { %v787_v8 = vld [vmem:[#allocation2 + $0x9b] sm:$0xff]  ;;  %v783_v16 = vmul.f32 %v781_v60, %v778_v63  ;;  %v836_v41 = vmul.f32 %v834_v9, %v1382_v57  ;;  %v767_v42 = vadd.f32 %v765_v25, %v697_v4  ;;  %v793_v28 = vadd.f32 %v791_v53, %v722_v5  ;;  %v886_v22 = vld [vmem:[#allocation6 + $0x100] sm:$0xff]  ;;  %v905_v53 = vld [vmem:[#allocation6 + $0x228] sm:$0xff] }
  0xeb   :  { %v796_v13 = vld [vmem:[#allocation2 + $0x9c] sm:$0xff]  ;;  %v862_v18 = vpop.permute.xlu1 %861  ;;  %v860_v2 = vpop.permute.xlu0 %859  ;;  %v792_v33 = vmul.f32 %v790_v23, %v787_v8  ;;  %v776_v43 = vadd.f32 %v774_v20, %v706_v12  ;;  %v802_v47 = vadd.f32 %v800_v26, %v766_v1  ;;  %v904_v60 = vld [vmem:[#allocation6 + $0x220] sm:$0xff]  ;;  %v887_v12 = vld [vmem:[#allocation6 + $0x108] sm:$0xff] }
  0xec   :  { %v807_v15 = vld [vmem:[#allocation6 + $0x330] sm:$0xff]  ;;  %v1400_v17 = vsel %vm863_vm6, %v860_v2, %v862_v18  ;;  %v808_v27 = vld [vmem:[#allocation6 + $0x338] sm:$0xff]  ;;  %v801_v38 = vmul.f32 %v799_v14, %v796_v13  ;;  %v785_v46 = vadd.f32 %v783_v16, %v715_v19  ;;  %v922_v26 = vld [vmem:[#allocation6 + $0x340] sm:$0xff] }
  0xed   :  { %v877_v59 = vld [vmem:[#allocation6 + $0x70] sm:$0xff]  ;;  %873 = vst [vmem:[#allocation2 + $0xb8] sm:$0xff] %v1400_v17  ;;  %v826_v44 = vld [vmem:[#allocation6 + $0x458] sm:$0xff]  ;;  %v794_v57 = vadd.f32 %v792_v33, %v723_v21  ;;  %v837_v18 = vadd.f32 %v835_v49, %v802_v47 }
  0xee   :  { %v804_v34 = vld [vmem:[#allocation2 + $0x95] sm:$0xff]  ;;  %v805_v39 = vld [vmem:[#allocation2 + $0x9d] sm:$0xff]  ;;  %v879_v32 = vmul.f32 %v877_v59, %v1390_v31  ;;  %v803_v31 = vadd.f32 %v801_v38, %v767_v42 }
  0xef   :  { %v813_v36 = vld [vmem:[#allocation2 + $0x96] sm:$0xff]  ;;  %v814_v52 = vld [vmem:[#allocation2 + $0x9e] sm:$0xff]  ;;  %v969_v45 = vpop.permute.xlu1 %968  ;;  %v967_v6 = vpop.permute.xlu0 %966  ;;  %v809_v50 = vmul.f32 %v807_v15, %v804_v34  ;;  %v810_v54 = vmul.f32 %v808_v27, %v805_v39 }
  0xf0   :  { %v822_v40 = vld [vmem:[#allocation2 + $0x97] sm:$0xff]  ;;  %v818_v10 = vmul.f32 %v816_v29, %v813_v36  ;;  %v823_v48 = vld [vmem:[#allocation2 + $0x9f] sm:$0xff]  ;;  %v1407_v55 = vsel %vm978_vm7, %v967_v6, %v969_v45  ;;  %v883_v24 = vld [vmem:[#allocation2 + $0xa9] sm:$0xff]  ;;  %v819_v3 = vmul.f32 %v817_v35, %v814_v52  ;;  %v838_v49 = vadd.f32 %v836_v41, %v803_v31 }
  0xf1   :  { %v895_v51 = vld [vmem:[#allocation6 + $0x190] sm:$0xff]  ;;  %v827_v58 = vmul.f32 %v825_v56, %v822_v40  ;;  %v892_v61 = vld [vmem:[#allocation2 + $0xaa] sm:$0xff]  ;;  %986 = vst [vmem:[#allocation2 + $0xc0] sm:$0xff] %v1407_v55  ;;  %v811_v63 = vadd.f32 %v809_v50, %v775_v30  ;;  %v878_v5 = vld [vmem:[#allocation6 + $0x78] sm:$0xff]  ;;  %v812_v8 = vadd.f32 %v810_v54, %v776_v43  ;;  %v828_v23 = vmul.f32 %v826_v44, %v823_v48 }
  0xf2   :  { %v901_v62 = vld [vmem:[#allocation2 + $0xab] sm:$0xff]  ;;  %v820_v4 = vadd.f32 %v818_v10, %v784_v37  ;;  %v913_v11 = vld [vmem:[#allocation6 + $0x2b0] sm:$0xff]  ;;  %v888_v19 = vmul.f32 %v886_v22, %v883_v24  ;;  %v896_v20 = vld [vmem:[#allocation6 + $0x198] sm:$0xff]  ;;  %v821_v15 = vadd.f32 %v819_v3, %v785_v46  ;;  %v897_v2 = vmul.f32 %v895_v51, %v892_v61 }
  0xf3   :  { %v910_v7 = vld [vmem:[#allocation2 + $0xac] sm:$0xff]  ;;  %v829_v9 = vadd.f32 %v827_v58, %v793_v28  ;;  %v973_v13 = vpop.permute.xlu1 %972  ;;  %v971_v14 = vpop.permute.xlu0 %970  ;;  %v906_v21 = vmul.f32 %v904_v60, %v901_v62  ;;  %v914_v25 = vld [vmem:[#allocation6 + $0x2b8] sm:$0xff]  ;;  %v830_v56 = vadd.f32 %v828_v23, %v794_v57  ;;  %v880_v59 = vmul.f32 %v878_v5, %v1395_v0  ;;  %v931_v36 = vld [vmem:[#allocation6 + $0x3d0] sm:$0xff] }
  0xf4   :  { %v919_v16 = vld [vmem:[#allocation2 + $0xad] sm:$0xff]  ;;  %v1411_v29 = vsel %vm978_vm7, %v971_v14, %v973_v13  ;;  %v915_v27 = vmul.f32 %v913_v11, %v910_v7  ;;  %v948_v37 = vld [vmem:[#allocation6 + $0x4f0] sm:$0xff]  ;;  %v932_v43 = vld [vmem:[#allocation6 + $0x3d8] sm:$0xff]  ;;  %v881_v28 = vadd.f32 %v879_v32, %v811_v63  ;;  %v890_v44 = vadd.f32 %v888_v19, %v820_v4 }
  0xf5   :  { %v884_v1 = vld [vmem:[#allocation2 + $0xb1] sm:$0xff]  ;;  %v940_v30 = vld [vmem:[#allocation6 + $0x460] sm:$0xff]  ;;  %987 = vst [vmem:[#allocation2 + $0xc8] sm:$0xff] %v1411_v29  ;;  %v882_v52 = vadd.f32 %v880_v59, %v812_v8  ;;  %v899_v48 = vadd.f32 %v897_v2, %v829_v9  ;;  %v908_v51 = vadd.f32 %v906_v21, %v837_v18  ;;  %v924_v60 = vmul.f32 %v922_v26, %v919_v16  ;;  %v949_v62 = vld [vmem:[#allocation6 + $0x4f8] sm:$0xff] }
  0xf6   :  { %v893_v33 = vld [vmem:[#allocation2 + $0xb2] sm:$0xff]  ;;  %v889_v38 = vmul.f32 %v887_v12, %v884_v1  ;;  %v917_v61 = vadd.f32 %v915_v27, %v881_v28  ;;  %v992_v31 = vld [vmem:[#allocation6 + $0x80] sm:$0xff]  ;;  %v950_v5 = vmul.f32 %v948_v37, %v1395_v0  ;;  %v951_v18 = vmul.f32 %v949_v62, %v1400_v17 }
  0xf7   :  { %v902_v34 = vld [vmem:[#allocation2 + $0xb3] sm:$0xff]  ;;  %v898_v39 = vmul.f32 %v896_v20, %v893_v33  ;;  %v977_v47 = vpop.permute.xlu1 %976  ;;  %v975_v50 = vpop.permute.xlu0 %974  ;;  %v1063_v8 = vld [vmem:[#allocation6 + $0x500] sm:$0xff]  ;;  %v926_v9 = vadd.f32 %v924_v60, %v890_v44  ;;  %v994_v2 = vmul.f32 %v992_v31, %v1407_v55  ;;  %v1002_v33 = vld [vmem:[#allocation6 + $0x118] sm:$0xff] }
  0xf8   :  { %v907_v35 = vmul.f32 %v905_v53, %v902_v34  ;;  %v911_v40 = vld [vmem:[#allocation2 + $0xb4] sm:$0xff]  ;;  %v891_v10 = vadd.f32 %v889_v38, %v821_v15  ;;  %v1416_v58 = vsel %vm978_vm7, %v975_v50, %v977_v47  ;;  %v1010_v20 = vld [vmem:[#allocation6 + $0x1a0] sm:$0xff]  ;;  %v952_v59 = vadd.f32 %v950_v5, %v917_v61 }
  0xf9   :  { %v923_v42 = vld [vmem:[#allocation6 + $0x348] sm:$0xff]  ;;  %v916_v22 = vmul.f32 %v914_v25, %v911_v40  ;;  %v900_v24 = vadd.f32 %v898_v39, %v830_v56  ;;  %988 = vst [vmem:[#allocation2 + $0xd0] sm:$0xff] %v1416_v58  ;;  %v1001_v11 = vld [vmem:[#allocation6 + $0x110] sm:$0xff]  ;;  %v1028_v13 = vld [vmem:[#allocation6 + $0x2c0] sm:$0xff]  ;;  %v996_v40 = vadd.f32 %v994_v2, %v926_v9  ;;  %v1065_v44 = vmul.f32 %v1063_v8, %v1411_v29 }
  0xfa   :  { %v920_v45 = vld [vmem:[#allocation2 + $0xb5] sm:$0xff]  ;;  %v909_v32 = vadd.f32 %v907_v35, %v838_v49  ;;  %v1046_v25 = vld [vmem:[#allocation6 + $0x3e0] sm:$0xff] }
  0xfb   :  { %v928_v6 = vld [vmem:[#allocation2 + $0xae] sm:$0xff]  ;;  %v929_v41 = vld [vmem:[#allocation2 + $0xb6] sm:$0xff]  ;;  %v925_v63 = vmul.f32 %v923_v42, %v920_v45  ;;  %v918_v23 = vadd.f32 %v916_v22, %v882_v52  ;;  %v1020_v42 = vld [vmem:[#allocation6 + $0x238] sm:$0xff] }
  0xfc   :  { %v937_v46 = vld [vmem:[#allocation2 + $0xaf] sm:$0xff]  ;;  %v938_v57 = vld [vmem:[#allocation2 + $0xb7] sm:$0xff]  ;;  %v933_v3 = vmul.f32 %v931_v36, %v928_v6  ;;  %v934_v12 = vmul.f32 %v932_v43, %v929_v41  ;;  %v998_v1 = vld [vmem:[#allocation2 + $0xc1] sm:$0xff] }
  0xfd   :  { %v941_v54 = vld [vmem:[#allocation6 + $0x468] sm:$0xff]  ;;  %v942_v4 = vmul.f32 %v940_v30, %v937_v46  ;;  %v1019_v53 = vld [vmem:[#allocation6 + $0x230] sm:$0xff]  ;;  %v927_v14 = vadd.f32 %v925_v63, %v891_v10  ;;  %v1007_v34 = vld [vmem:[#allocation2 + $0xc2] sm:$0xff]  ;;  %v1003_v37 = vmul.f32 %v1001_v11, %v998_v1  ;;  %v953_v35 = vadd.f32 %v951_v18, %v918_v23 }
  0xfe   :  { %v993_v7 = vld [vmem:[#allocation6 + $0x88] sm:$0xff]  ;;  %v943_v19 = vmul.f32 %v941_v54, %v938_v57  ;;  %v935_v15 = vadd.f32 %v933_v3, %v899_v48  ;;  %v1037_v21 = vld [vmem:[#allocation6 + $0x350] sm:$0xff]  ;;  %v936_v0 = vadd.f32 %v934_v12, %v900_v24  ;;  %v1016_v36 = vld [vmem:[#allocation2 + $0xc3] sm:$0xff]  ;;  %v1012_v49 = vmul.f32 %v1010_v20, %v1007_v34 }
  0xff   :  { %v1055_v16 = vld [vmem:[#allocation6 + $0x470] sm:$0xff]  ;;  %v944_v26 = vadd.f32 %v942_v4, %v908_v51  ;;  %v1011_v27 = vld [vmem:[#allocation6 + $0x1a8] sm:$0xff]  ;;  %v995_v30 = vmul.f32 %v993_v7, %v1411_v29  ;;  %v1021_v38 = vmul.f32 %v1019_v53, %v1016_v36  ;;  %v1025_v17 = vld [vmem:[#allocation2 + $0xc4] sm:$0xff] }
 0x100   :  { %v945_v56 = vadd.f32 %v943_v19, %v909_v32  ;;  %v1034_v39 = vld [vmem:[#allocation2 + $0xc5] sm:$0xff]  ;;  %v1029_v43 = vld [vmem:[#allocation6 + $0x2c8] sm:$0xff]  ;;  %v1030_v28 = vmul.f32 %v1028_v13, %v1025_v17  ;;  %v1005_v45 = vadd.f32 %v1003_v37, %v935_v15 }
 0x101   :  { %v1043_v55 = vld [vmem:[#allocation2 + $0xc6] sm:$0xff]  ;;  %v997_v22 = vadd.f32 %v995_v30, %v927_v14  ;;  %v1014_v6 = vadd.f32 %v1012_v49, %v944_v26  ;;  %v1039_v47 = vmul.f32 %v1037_v21, %v1034_v39  ;;  %v1047_v50 = vld [vmem:[#allocation6 + $0x3e8] sm:$0xff]  ;;  %v1023_v57 = vadd.f32 %v1021_v38, %v952_v59 }
 0x102   :  { %v1052_v52 = vld [vmem:[#allocation2 + $0xc7] sm:$0xff]  ;;  %v1064_v48 = vld [vmem:[#allocation6 + $0x508] sm:$0xff]  ;;  %v1032_v54 = vadd.f32 %v1030_v28, %v996_v40  ;;  %v1048_v24 = vmul.f32 %v1046_v25, %v1043_v55 }
 0x103   :  { %v1038_v46 = vld [vmem:[#allocation6 + $0x358] sm:$0xff]  ;;  %v999_v51 = vld [vmem:[#allocation2 + $0xc9] sm:$0xff]  ;;  %v1057_v32 = vmul.f32 %v1055_v16, %v1052_v52  ;;  %v1041_v3 = vadd.f32 %v1039_v47, %v1005_v45  ;;  %v1066_v14 = vmul.f32 %v1064_v48, %v1416_v58 }
 0x104   :  { %v1056_v10 = vld [vmem:[#allocation6 + $0x478] sm:$0xff]  ;;  %v1008_v60 = vld [vmem:[#allocation2 + $0xca] sm:$0xff]  ;;  %v1004_v61 = vmul.f32 %v1002_v33, %v999_v51  ;;  %v1050_v8 = vadd.f32 %v1048_v24, %v1014_v6  ;;  %v1067_v15 = vadd.f32 %v1065_v44, %v1032_v54 }
 0x105   :  { %v1017_v41 = vld [vmem:[#allocation2 + $0xcb] sm:$0xff]  ;;  %v1013_v62 = vmul.f32 %v1011_v27, %v1008_v60  ;;  %v1059_v13 = vadd.f32 %v1057_v32, %v1023_v57 }
 0x106   :  { %v1022_v31 = vmul.f32 %v1020_v42, %v1017_v41  ;;  %v1026_v63 = vld [vmem:[#allocation2 + $0xcc] sm:$0xff]  ;;  %v1006_v9 = vadd.f32 %v1004_v61, %v936_v0  ;;  %v1069_v16 = vadd.f32 %v1067_v15, %v1041_v3 }
 0x107   :  { %v1035_v29 = vld [vmem:[#allocation2 + $0xcd] sm:$0xff]  ;;  %v1031_v5 = vmul.f32 %v1029_v43, %v1026_v63  ;;  %v1015_v12 = vadd.f32 %v1013_v62, %v945_v56  ;;  %v1071_v26 = vadd.f32 %v1059_v13, %v1050_v8 }
 0x108   :  { %v1044_v4 = vld [vmem:[#allocation2 + $0xce] sm:$0xff]  ;;  %v1040_v7 = vmul.f32 %v1038_v46, %v1035_v29  ;;  %v1024_v19 = vadd.f32 %v1022_v31, %v953_v35 }
 0x109   :  { %v1049_v11 = vmul.f32 %v1047_v50, %v1044_v4  ;;  %v1053_v23 = vld [vmem:[#allocation2 + $0xcf] sm:$0xff]  ;;  %v1033_v53 = vadd.f32 %v1031_v5, %v997_v22  ;;  %v1073_v33 = vadd.f32 %v1071_v26, %v1069_v16 }
 0x10a   :  { %v1058_v20 = vmul.f32 %v1056_v10, %v1053_v23  ;;  %v1042_v18 = vadd.f32 %v1040_v7, %v1006_v9 }
 0x10b   :  { %v1051_v2 = vadd.f32 %v1049_v11, %v1015_v12  ;;  %v1068_v25 = vadd.f32 %v1066_v14, %v1033_v53  ;;  %v1075_v56 = vmax.f32 %v1073_v33, 0.0 }
 0x10c   :  { %v1060_v21 = vadd.f32 %v1058_v20, %v1024_v19 }
 0x10d   :  { %v1070_v1 = vadd.f32 %v1068_v25, %v1042_v18  ;;  %1077 = vst [vmem:[#allocation9] sm:$0xff] %v1075_v56 }
 0x10e   :  { %v1072_v59 = vadd.f32 %v1060_v21, %v1051_v2 }
 0x110   :  { %v1074_v0 = vadd.f32 %v1072_v59, %v1070_v1 }
 0x112   :  { %v1076_v34 = vmax.f32 %v1074_v0, 0.0 }
 0x114   :  { %1078 = vst [vmem:[#allocation9 + $0x8] sm:$0xff] %v1076_v34 }
 0x115   :  { %1186 = shalt.err (!%p1183_p5)
}
 0x116   :  { %1090 = dma.vmem_to_hbm [thread:$0]  %s1085_s10, 256, %s1434_s3, [#allocation5], %s1202_s15, %s1202_s15, %s1203_s16  }
 0x117   :  { %1199 = dma.done.wait [#allocation5], 256  }
 0x118   :  { %1200 = vsyncadd [#allocation5], 4294967040 }
 0x119   :  { %1094 = vsyncpa [#allocation4], 1 }
 0x11a   :  { %1095 = vsyncpa [#allocation7], 1 }
 0x11b   :  { %1096 = vsyncpa [#allocation5], 1 }

</bundles_post_ra>
